<compile_context>
chip_gen: v6e
topology: v6e:2x2x1
jax: 0.10.0
libtpu: 0.0.40
codegen_flags: <defaults>
</compile_context>

<pallas_src>
import math

import jax
import jax.numpy as jnp
from jax.experimental import pallas as pl
from jax.experimental.pallas import tpu as pltpu

# Packed rows per grid step.  Each packed row is R batch rows, so 512 packed
# rows == 16384 batch rows per step (for na=4).
_MAX_ROWS_PER_BLOCK = 512


def _mlp_kernel(x_ref, w1_ref, b1_ref, w2_ref, b2_ref, o_ref):
    # x_ref : (rb, R*ni)  bf16      w1_ref: (R*ni, R*h)  bf16
    # b1_ref: (1, R*h)    f32       w2_ref: (R*h, R*na)  bf16
    # b2_ref: (1, R*na)   f32       o_ref : (rb, R*na)   f32
    h = jnp.dot(x_ref[...], w1_ref[...], preferred_element_type=jnp.float32)
    h = jnp.maximum(h + b1_ref[...], 0.0)                    # bias + ReLU in f32
    q = jnp.dot(h.astype(jnp.bfloat16), w2_ref[...],
                preferred_element_type=jnp.float32)
    o_ref[...] = (q + b2_ref[...]).astype(o_ref.dtype)


def mlp_forward(x, w1, b1, w2, b2):
    """Forward pass matching MLP.forward: flatten -> Linear -> ReLU -> Linear.

    x : (B, ...)  flattened to (B, n_inputs)
    w1: (n_inputs, hidden), b1: (hidden,)     (stored (in, out) = PyTorch W.T)
    w2: (hidden, na),       b2: (na,)
    returns (B, na) float32
    """
    B = x.shape[0]
    n_in, hidden = w1.shape
    na = w2.shape[1]
    x2d = x.reshape(B, -1)                                   # nn.Flatten()
    assert x2d.shape[1] == n_in

    # Lane packing factor: R batch rows per kernel row so the stored last dim
    # (R * na) is a multiple of 128 -> no masked partial stores.
    R = 128 // math.gcd(na, 128)
    # TODO(synk): for very large n_inputs the R^2-replicated block-diag W1
    # (R*n_in x R*hidden) would outgrow VMEM; fall back to an unpacked kernel
    # there.  Irrelevant for this small Q-network MLP (n_inputs ~ tens).

    rows_needed = pl.cdiv(B, R)
    if rows_needed <= _MAX_ROWS_PER_BLOCK:
        rows_block = rows_needed            # single block == full array dims
        rows_total = rows_needed
    else:
        rows_block = _MAX_ROWS_PER_BLOCK    # multiple of 8 -> valid sublane tile
        rows_total = pl.cdiv(rows_needed, rows_block) * rows_block
    b_pad = rows_total * R

    # Stream x in bf16 (halves HBM bytes of the only large operand); pad the
    # batch tail with zeros (no-op when already aligned), then lane-pack.
    x_bf = x2d.astype(jnp.bfloat16)
    if b_pad != B:
        x_bf = jnp.pad(x_bf, ((0, b_pad - B), (0, 0)))
    x_wide = x_bf.reshape(rows_total, R * n_in)              # row-major: free reshape

    # Block-diagonal packed weights (R copies of W on the diagonal).  Tiny
    # one-time work (fused into the jit); hoist out of the step loop in a real
    # training/inference loop if the weights are reused across many forwards.
    eye = jnp.eye(R, dtype=jnp.float32)
    w1_big = jnp.kron(eye, w1.astype(jnp.float32)).astype(jnp.bfloat16)   # (R*ni, R*h)
    w2_big = jnp.kron(eye, w2.astype(jnp.float32)).astype(jnp.bfloat16)   # (R*h, R*na)
    b1_big = jnp.tile(b1.astype(jnp.float32), R).reshape(1, R * hidden)
    b2_big = jnp.tile(b2.astype(jnp.float32), R).reshape(1, R * na)

    grid = (rows_total // rows_block,)
    cost = pl.CostEstimate(
        flops=2 * b_pad * (n_in * hidden + hidden * na),
        transcendentals=0,
        bytes_accessed=(b_pad * n_in * 2 + b_pad * na * 4
                        + w1_big.size * 2 + w2_big.size * 2
                        + (b1_big.size + b2_big.size) * 4),
    )

    q_wide = pl.pallas_call(
        _mlp_kernel,
        out_shape=jax.ShapeDtypeStruct((rows_total, R * na), jnp.float32),
        grid_spec=pltpu.PrefetchScalarGridSpec(
            num_scalar_prefetch=0,
            grid=grid,
            in_specs=[
                # x: tiled along packed-row (batch) axis -> pipelined DMA stream.
                pl.BlockSpec((rows_block, R * n_in), lambda i: (i, 0)),
                # Weights/biases: constant index_maps -> DMA'd once, VMEM resident.
                pl.BlockSpec((R * n_in, R * hidden), lambda i: (0, 0)),
                pl.BlockSpec((1, R * hidden), lambda i: (0, 0)),
                pl.BlockSpec((R * hidden, R * na), lambda i: (0, 0)),
                pl.BlockSpec((1, R * na), lambda i: (0, 0)),
            ],
            out_specs=pl.BlockSpec((rows_block, R * na), lambda i: (i, 0)),
        ),
        compiler_params=pltpu.CompilerParams(
            dimension_semantics=("parallel",),   # v7x megacore over batch tiles
        ),
        cost_estimate=cost,
    )(x_wide, w1_big, b1_big, w2_big, b2_big)

    # Unpack lanes back to (B, na): row-major reshape, then drop padding rows.
    return q_wide.reshape(b_pad, na)[:B]


def init_params(key, n_inputs, na, hidden=32):
    """Deterministic init mirroring nn.Linear default U(-1/sqrt(fan_in), 1/sqrt(fan_in))."""
    k1, k2, k3, k4 = jax.random.split(key, 4)
    lim1 = 1.0 / jnp.sqrt(jnp.float32(n_inputs))
    lim2 = 1.0 / jnp.sqrt(jnp.float32(hidden))
    # Stored (in, out); PyTorch stores (out, in) -- just the transpose.
    w1 = jax.random.uniform(k1, (n_inputs, hidden), jnp.float32, -lim1, lim1)
    b1 = jax.random.uniform(k2, (hidden,), jnp.float32, -lim1, lim1)
    w2 = jax.random.uniform(k3, (hidden, na), jnp.float32, -lim2, lim2)
    b2 = jax.random.uniform(k4, (na,), jnp.float32, -lim2, lim2)
    return w1, b1, w2, b2


def _check(q, x, w1, b1, w2, b2):
    B = x.shape[0]
    x2d = x.reshape(B, -1)
    # Reference 1: same bf16 rounding of x / weights / hidden as the kernel
    # (tight tolerance; only accumulation-order differences remain).
    xb = x2d.astype(jnp.bfloat16).astype(jnp.float32)
    w1b = w1.astype(jnp.bfloat16).astype(jnp.float32)
    w2b = w2.astype(jnp.bfloat16).astype(jnp.float32)
    h_ref = jnp.maximum(xb @ w1b + b1, 0.0)
    ref_bf16 = h_ref.astype(jnp.bfloat16).astype(jnp.float32) @ w2b + b2
    assert jnp.allclose(q, ref_bf16, atol=2e-3, rtol=2e-3), "mismatch vs bf16 reference"
    # Reference 2: exact f32 PyTorch semantics (loose tolerance for bf16 streaming).
    ref_f32 = jnp.maximum(x2d @ w1 + b1, 0.0) @ w2 + b2
    assert jnp.allclose(q, ref_f32, atol=5e-2, rtol=5e-2), "mismatch vs f32 reference"


if __name__ == "__main__":
    key = jax.random.PRNGKey(0)
    kx, kx2, kp = jax.random.split(key, 3)

    # Small synthetic state: batch=2, state (4, 4) -> n_inputs = 16, na = 4.
    B, H, W = 2, 4, 4
    n_inputs, na = H * W, 4

    x = jax.random.normal(kx, (B, H, W), jnp.float32)
    w1, b1, w2, b2 = init_params(kp, n_inputs, na)

    fwd = jax.jit(mlp_forward)
    q = jax.block_until_ready(fwd(x, w1, b1, w2, b2))
    assert q.shape == (B, na)
    _check(q, x, w1, b1, w2, b2)

    # Second small case exercising the batch-padding / lane-unpack path
    # (B not a multiple of the packing factor R).
    B2 = 37
    x2 = jax.random.normal(kx2, (B2, H, W), jnp.float32)
    q2 = jax.block_until_ready(fwd(x2, w1, b1, w2, b2))
    assert q2.shape == (B2, na)
    _check(q2, x2, w1, b1, w2, b2)

    print("KERNEL_OK")
</pallas_src>

<mosaic_0001>
module attributes {stable_mosaic.version = 11 : i64} {
  func.func @_mlp_kernel(%arg0: i32, %arg1: memref<1x512xbf16, #tpu.memory_space<vmem>>, %arg2: memref<512x1024xbf16, #tpu.memory_space<vmem>>, %arg3: memref<1x1024xf32, #tpu.memory_space<vmem>>, %arg4: memref<1024x128xbf16, #tpu.memory_space<vmem>>, %arg5: memref<1x128xf32, #tpu.memory_space<vmem>>, %arg6: memref<1x128xf32, #tpu.memory_space<vmem>>) attributes {dimension_semantics = [#tpu.dimension_semantics<parallel>], iteration_bounds = array<i64: 1>, scalar_prefetch = 0 : i64, scratch_operands = 0 : i64, tpu.core_type = #tpu.core_type<tc>, window_params = [{transform_indices = @transform_0, window_bounds = array<i64: 1, 512>}, {pipeline_mode = #tpu.pipeline_mode<synchronous>, transform_indices = @transform_1, window_bounds = array<i64: 512, 1024>}, {pipeline_mode = #tpu.pipeline_mode<synchronous>, transform_indices = @transform_2, window_bounds = array<i64: 1, 1024>}, {pipeline_mode = #tpu.pipeline_mode<synchronous>, transform_indices = @transform_3, window_bounds = array<i64: 1024, 128>}, {pipeline_mode = #tpu.pipeline_mode<synchronous>, transform_indices = @transform_4, window_bounds = array<i64: 1, 128>}, {transform_indices = @transform_5, window_bounds = array<i64: 1, 128>}]} {
    %c0 = arith.constant 0 : index
    %c0_0 = arith.constant 0 : index
    %0 = vector.load %arg1[%c0, %c0_0] : memref<1x512xbf16, #tpu.memory_space<vmem>>, vector<1x512xbf16>
    %c0_1 = arith.constant 0 : index
    %c0_2 = arith.constant 0 : index
    %1 = vector.load %arg2[%c0_1, %c0_2] : memref<512x1024xbf16, #tpu.memory_space<vmem>>, vector<512x1024xbf16>
    %cst = arith.constant dense<0.000000e+00> : vector<1x1024xf32>
    %2 = tpu.matmul %0, %1, %cst {dimension_numbers = #tpu.dot_dimension_numbers<[1], [0], [0], [1], [0, 0, 1, 1], [], []>} : vector<1x512xbf16>, vector<512x1024xbf16>, vector<1x1024xf32> -> vector<1x1024xf32>
    %c0_3 = arith.constant 0 : index
    %c0_4 = arith.constant 0 : index
    %3 = vector.load %arg3[%c0_3, %c0_4] : memref<1x1024xf32, #tpu.memory_space<vmem>>, vector<1x1024xf32>
    %4 = arith.addf %2, %3 : vector<1x1024xf32>
    %cst_5 = arith.constant 0.000000e+00 : f32
    %5 = vector.broadcast %cst_5 : f32 to vector<1x1024xf32>
    %6 = arith.maximumf %4, %5 : vector<1x1024xf32>
    %7 = arith.truncf %6 : vector<1x1024xf32> to vector<1x1024xbf16>
    %c0_6 = arith.constant 0 : index
    %c0_7 = arith.constant 0 : index
    %8 = vector.load %arg4[%c0_6, %c0_7] : memref<1024x128xbf16, #tpu.memory_space<vmem>>, vector<1024x128xbf16>
    %cst_8 = arith.constant dense<0.000000e+00> : vector<1x128xf32>
    %9 = tpu.matmul %7, %8, %cst_8 {dimension_numbers = #tpu.dot_dimension_numbers<[1], [0], [0], [1], [0, 0, 1, 1], [], []>} : vector<1x1024xbf16>, vector<1024x128xbf16>, vector<1x128xf32> -> vector<1x128xf32>
    %c0_9 = arith.constant 0 : index
    %c0_10 = arith.constant 0 : index
    %10 = vector.load %arg5[%c0_9, %c0_10] : memref<1x128xf32, #tpu.memory_space<vmem>>, vector<1x128xf32>
    %11 = arith.addf %9, %10 : vector<1x128xf32>
    %c0_11 = arith.constant 0 : index
    %c0_12 = arith.constant 0 : index
    %12 = vector.load %arg6[%c0_11, %c0_12] : memref<1x128xf32, #tpu.memory_space<vmem>>, vector<1x128xf32>
    tpu.vector_store %arg6[%c0_11, %c0_12], %11 {strides = array<i32>} : memref<1x128xf32, #tpu.memory_space<vmem>>, vector<1x128xf32>,
    return
  }
  func.func @transform_0(%arg0: i32) -> (i32, i32) {
    %c0_i32 = arith.constant 0 : i32
    %c0_i32_0 = arith.constant 0 : i32
    return %arg0, %c0_i32 : i32, i32
  }
  func.func @transform_1(%arg0: i32) -> (i32, i32) {
    %c0_i32 = arith.constant 0 : i32
    %c0_i32_0 = arith.constant 0 : i32
    %c0_i32_1 = arith.constant 0 : i32
    return %c0_i32, %c0_i32_0 : i32, i32
  }
  func.func @transform_2(%arg0: i32) -> (i32, i32) {
    %c0_i32 = arith.constant 0 : i32
    %c0_i32_0 = arith.constant 0 : i32
    %c0_i32_1 = arith.constant 0 : i32
    return %c0_i32, %c0_i32_0 : i32, i32
  }
  func.func @transform_3(%arg0: i32) -> (i32, i32) {
    %c0_i32 = arith.constant 0 : i32
    %c0_i32_0 = arith.constant 0 : i32
    %c0_i32_1 = arith.constant 0 : i32
    return %c0_i32, %c0_i32_0 : i32, i32
  }
  func.func @transform_4(%arg0: i32) -> (i32, i32) {
    %c0_i32 = arith.constant 0 : i32
    %c0_i32_0 = arith.constant 0 : i32
    %c0_i32_1 = arith.constant 0 : i32
    return %c0_i32, %c0_i32_0 : i32, i32
  }
  func.func @transform_5(%arg0: i32) -> (i32, i32) {
    %c0_i32 = arith.constant 0 : i32
    %c0_i32_0 = arith.constant 0 : i32
    return %arg0, %c0_i32 : i32, i32
  }
}

</mosaic_0001>

<bundles_post_ra>
// kernel: tile.13
= control target key start
LH: loop header
LB: loop body
LE: loop exit
PB: predicated region body
PF: predicated region fallthrough
CT: control target
= control target key end

     0   :  { %s40_s0 = inlined_call_operand.vmem [shape: f32[32], index: 0, kind: input, shape index: {}]   ;;  %s41_s1 = inlined_call_operand.vmem [shape: f32[32,32], index: 1, kind: output, shape index: {}]  }
   0x1   :  { %v4_v0 = vld [vmem:[%s40_s0] ss:$0 sm:$0xff] }
   0x2   :  { %5 = vst [vmem:[%s41_s1] sm:$0xff] %v4_v0  ;;  %12 = vst [vmem:[%s41_s1 + $0x8] sm:$0xff] %v4_v0 }
   0x3   :  { %13 = vst [vmem:[%s41_s1 + $0x10] sm:$0xff] %v4_v0  ;;  %14 = vst [vmem:[%s41_s1 + $0x18] sm:$0xff] %v4_v0 }

// kernel: tile.14
= control target key start
LH: loop header
LB: loop body
LE: loop exit
PB: predicated region body
PF: predicated region fallthrough
CT: control target
= control target key end

     0   :  { %s102_s8 = smov 96   ;;  %vm3_vm0 = vcmask 261120   ;;  %s104_s15 = smov 64   ;;  %vm10_vm1 = vcmask 1048320   ;;  %vm17_vm2 = vcmask 785920   ;;  %vm24_vm3 = vcmask 523520   ;;  %s151_s0 = inlined_call_operand.vmem [shape: f32[32,32], index: 0, kind: input, shape index: {}]   ;;  %s152_s1 = inlined_call_operand.vmem [shape: f32[1,1024], index: 1, kind: output, shape index: {}]  }
   0x1   :  { %v89_v0 = vld [vmem:[%s151_s0 + $0x3] ss:$4 sm:$0xff]   ;;  %v91_v1 = vld [vmem:[%s151_s0 + $0x1] ss:$4 sm:$0xff]   ;;  %v2_v2 = vld [vmem:[%s151_s0] ss:$4 sm:$0xff]  }
   0x2   :  { %8 = vrot.lane.b32.xlu0 %v89_v0, %s102_s8  ;;  %v90_v3 = vld [vmem:[%s151_s0 + $0x2] ss:$4 sm:$0xff]   ;;  %s103_s0 = smov 32   ;;  %4 = vst.msk [vmem:[#allocation0] ss:$8 sm:$0xf] %vm3_vm0, %v2_v2  }
   0x3   :  { %22 = vrot.lane.b32.xlu1 %v91_v1, %s103_s0  ;;  %5 = vst.msk [vmem:[#allocation0] ss:$8 sm:$0xf0] %vm3_vm0, %v2_v2  }
   0x6   :  { %15 = vrot.lane.b32.xlu0 %v90_v3, %s104_s15 }
  0x74   :  { %v9_v4 = vpop.permute.xlu0 %8  }
  0x75   :  { %11 = vst.msk [vmem:[#allocation0] ss:$8 sm:$0xf] %vm10_vm1, %v9_v4   ;;  %12 = vst.msk [vmem:[#allocation0] ss:$8 sm:$0xf0] %vm10_vm1, %v9_v4   ;;  %v23_v5 = vpop.permute.xlu1 %22  }
  0x78   :  { %v16_v6 = vpop.permute.xlu0 %15  }
  0x79   :  { %18 = vst.msk [vmem:[#allocation0] ss:$8 sm:$0xf] %vm17_vm2, %v16_v6   ;;  %19 = vst.msk [vmem:[#allocation0] ss:$8 sm:$0xf0] %vm17_vm2, %v16_v6  }
  0x7a   :  { %25 = vst.msk [vmem:[#allocation0] ss:$8 sm:$0xf] %vm24_vm3, %v23_v5   ;;  %26 = vst.msk [vmem:[#allocation0] ss:$8 sm:$0xf0] %vm24_vm3, %v23_v5  }
  0x81   :  { %v31_v7 = vld [vmem:[#allocation0] sm:$0x1]  ;;  %v36_v8 = vld [vmem:[#allocation0 + $0x8] sm:$0x1]  ;;  %v42_v9 = vld [vmem:[#allocation0 + $0x10] sm:$0x1] }
  0x82   :  { %34 = vst [vmem:[%s152_s1] sm:$0x1] %v31_v7  ;;  %92 = vst [vmem:[%s152_s1 + $0x1] sm:$0x1] %v36_v8  ;;  %v49_v10 = vld [vmem:[#allocation0 + $0x18] sm:$0x1] }
  0x83   :  { %93 = vst [vmem:[%s152_s1 + $0x2] sm:$0x1] %v42_v9  ;;  %v56_v11 = vld [vmem:[#allocation0 + $0x20] sm:$0x1]  ;;  %v63_v12 = vld [vmem:[#allocation0 + $0x28] sm:$0x1] }
  0x84   :  { %94 = vst [vmem:[%s152_s1 + $0x3] sm:$0x1] %v49_v10  ;;  %95 = vst [vmem:[%s152_s1 + $0x4] sm:$0x1] %v56_v11  ;;  %v70_v13 = vld [vmem:[#allocation0 + $0x30] sm:$0x1] }
  0x85   :  { %96 = vst [vmem:[%s152_s1 + $0x5] sm:$0x1] %v63_v12  ;;  %v77_v14 = vld [vmem:[#allocation0 + $0x38] sm:$0x1]  ;;  %97 = vst [vmem:[%s152_s1 + $0x6] sm:$0x1] %v70_v13 }
  0x86   :  { %98 = vst [vmem:[%s152_s1 + $0x7] sm:$0x1] %v77_v14 }

// kernel: tile.18
= control target key start
LH: loop header
LB: loop body
LE: loop exit
PB: predicated region body
PF: predicated region fallthrough
CT: control target
= control target key end

     0   :  { %s40_s0 = inlined_call_operand.vmem [shape: f32[4], index: 0, kind: input, shape index: {}]   ;;  %s41_s1 = inlined_call_operand.vmem [shape: f32[32,4], index: 1, kind: output, shape index: {}]  }
   0x1   :  { %v4_v0 = vld [vmem:[%s40_s0] ss:$0 sm:$0xff] }
   0x2   :  { %5 = vst [vmem:[%s41_s1] sm:$0xff] %v4_v0  ;;  %12 = vst [vmem:[%s41_s1 + $0x8] sm:$0xff] %v4_v0 }
   0x3   :  { %13 = vst [vmem:[%s41_s1 + $0x10] sm:$0xff] %v4_v0  ;;  %14 = vst [vmem:[%s41_s1 + $0x18] sm:$0xff] %v4_v0 }

// kernel: tile.19
= control target key start
LH: loop header
LB: loop body
LE: loop exit
PB: predicated region body
PF: predicated region fallthrough
CT: control target
= control target key end

     0   :  { %s261_s10 = smov 124   ;;  %s262_s11 = smov 116   ;;  %vm3_vm0 = vcmask 31744   ;;  %vm9_vm1 = vcmask 1048544   ;;  %vm15_vm2 = vcmask 1015744   ;;  %vm21_vm3 = vcmask 982944   ;;  %s401_s0 = inlined_call_operand.vmem [shape: f32[32,4], index: 0, kind: input, shape index: {}]   ;;  %s402_s1 = inlined_call_operand.vmem [shape: f32[1,128], index: 1, kind: output, shape index: {}]  }
   0x1   :  { %v199_v0 = vld [vmem:[%s401_s0 + $0x1f] sm:$0x1]   ;;  %v201_v1 = vld [vmem:[%s401_s0 + $0x1d] sm:$0x1]   ;;  %v200_v2 = vld [vmem:[%s401_s0 + $0x1e] sm:$0x1]  }
   0x2   :  { %7 = vrot.lane.b32.xlu0 %v199_v0, %s261_s10  ;;  %19 = vrot.lane.b32.xlu1 %v201_v1, %s262_s11  ;;  %v202_v3 = vld [vmem:[%s401_s0 + $0x1c] sm:$0x1]   ;;  %s263_s16 = smov 120   ;;  %s264_s17 = smov 112   ;;  %v203_v4 = vld [vmem:[%s401_s0 + $0x1b] sm:$0x1]  }
   0x3   :  { %v204_v5 = vld [vmem:[%s401_s0 + $0x1a] sm:$0x1]   ;;  %s265_s22 = smov 108   ;;  %s266_s23 = smov 104   ;;  %v205_v6 = vld [vmem:[%s401_s0 + $0x19] sm:$0x1]  }
   0x4   :  { %v206_v7 = vld [vmem:[%s401_s0 + $0x18] sm:$0x1]   ;;  %s267_s28 = smov 100   ;;  %s268_s29 = smov 96   ;;  %v207_v8 = vld [vmem:[%s401_s0 + $0x17] sm:$0x1]  }
   0x5   :  { %v208_v9 = vld [vmem:[%s401_s0 + $0x16] sm:$0x1]   ;;  %v2_v10 = vld [vmem:[%s401_s0] sm:$0x1]   ;;  %s269_s7 = smov 92   ;;  %s270_s8 = smov 88  }
   0x6   :  { %13 = vrot.lane.b32.xlu0 %v200_v2, %s263_s16  ;;  %25 = vrot.lane.b32.xlu1 %v202_v3, %s264_s17  ;;  %4 = vst.msk [vmem:[#allocation0] sm:$0x1] %vm3_vm0, %v2_v10   ;;  %v209_v11 = vld [vmem:[%s401_s0 + $0x15] sm:$0x1]   ;;  %v210_v12 = vld [vmem:[%s401_s0 + $0x14] sm:$0x1]  }
   0x7   :  { %s271_s13 = smov 84   ;;  %s272_s14 = smov 80   ;;  %v211_v13 = vld [vmem:[%s401_s0 + $0x13] sm:$0x1]   ;;  %v212_v14 = vld [vmem:[%s401_s0 + $0x12] sm:$0x1]  }
   0x8   :  { %s273_s19 = smov 76   ;;  %s274_s20 = smov 72   ;;  %v213_v15 = vld [vmem:[%s401_s0 + $0x11] sm:$0x1]   ;;  %v214_v16 = vld [vmem:[%s401_s0 + $0x10] sm:$0x1]  }
   0x9   :  { %s275_s25 = smov 68   ;;  %s276_s26 = smov 64   ;;  %v215_v17 = vld [vmem:[%s401_s0 + $0xf] sm:$0x1]   ;;  %v216_v18 = vld [vmem:[%s401_s0 + $0xe] sm:$0x1]  }
   0xa   :  { %31 = vrot.lane.b32.xlu0 %v203_v4, %s265_s22  ;;  %37 = vrot.lane.b32.xlu1 %v204_v5, %s266_s23  ;;  %s277_s2 = smov 60   ;;  %s278_s3 = smov 56   ;;  %v217_v19 = vld [vmem:[%s401_s0 + $0xd] sm:$0x1]   ;;  %v218_v20 = vld [vmem:[%s401_s0 + $0xc] sm:$0x1]  }
   0xb   :  { %s280_s9 = smov 48   ;;  %v219_v21 = vld [vmem:[%s401_s0 + $0xb] sm:$0x1]   ;;  %v220_v22 = vld [vmem:[%s401_s0 + $0xa] sm:$0x1]   ;;  %s282_s15 = smov 40  }
   0xc   :  { %v221_v23 = vld [vmem:[%s401_s0 + $0x9] sm:$0x1]   ;;  %v222_v24 = vld [vmem:[%s401_s0 + $0x8] sm:$0x1]   ;;  %s284_s21 = smov 32   ;;  %s286_s27 = smov 24  }
   0xd   :  { %v223_v25 = vld [vmem:[%s401_s0 + $0x7] sm:$0x1]   ;;  %v224_v26 = vld [vmem:[%s401_s0 + $0x6] sm:$0x1]   ;;  %v225_v27 = vld [vmem:[%s401_s0 + $0x5] sm:$0x1]  }
   0xe   :  { %43 = vrot.lane.b32.xlu0 %v205_v6, %s267_s28  ;;  %49 = vrot.lane.b32.xlu1 %v206_v7, %s268_s29  ;;  %v226_v28 = vld [vmem:[%s401_s0 + $0x4] sm:$0x1]   ;;  %s288_s4 = smov 16   ;;  %v227_v29 = vld [vmem:[%s401_s0 + $0x3] sm:$0x1]   ;;  %s290_s10 = smov 8  }
   0xf   :  { %v228_v30 = vld [vmem:[%s401_s0 + $0x2] sm:$0x1]   ;;  %v229_v31 = vld [vmem:[%s401_s0 + $0x1] sm:$0x1]   ;;  %s291_s0 = smov 4   ;;  %vm27_vm4 = vcmask 950144  }
  0x10   :  { %vm33_vm5 = vcmask 917344   ;;  %vm39_vm6 = vcmask 884544   ;;  %vm45_vm7 = vcmask 851744   ;;  %vm51_vm8 = vcmask 818944  }
  0x11   :  { %vm57_vm9 = vcmask 786144   ;;  %vm63_vm10 = vcmask 753344   ;;  %vm69_vm11 = vcmask 720544   ;;  %vm75_vm12 = vcmask 687744  }
  0x12   :  { %55 = vrot.lane.b32.xlu0 %v207_v8, %s269_s7  ;;  %61 = vrot.lane.b32.xlu1 %v208_v9, %s270_s8  ;;  %s279_s8 = smov 52   ;;  %vm81_vm13 = vcmask 654944   ;;  %vm87_vm14 = vcmask 622144   ;;  %vm93_vm15 = vcmask 589344   ;;  %vm99_vm0 = vcmask 556544  }
  0x16   :  { %67 = vrot.lane.b32.xlu0 %v209_v11, %s271_s13  ;;  %73 = vrot.lane.b32.xlu1 %v210_v12, %s272_s14  ;;  %s281_s14 = smov 44  }
  0x1a   :  { %79 = vrot.lane.b32.xlu0 %v211_v13, %s273_s19  ;;  %85 = vrot.lane.b32.xlu1 %v212_v14, %s274_s20  ;;  %s283_s20 = smov 36  }
  0x1e   :  { %91 = vrot.lane.b32.xlu0 %v213_v15, %s275_s25  ;;  %97 = vrot.lane.b32.xlu1 %v214_v16, %s276_s26  ;;  %s285_s26 = smov 28  }
  0x22   :  { %103 = vrot.lane.b32.xlu0 %v215_v17, %s277_s2  ;;  %109 = vrot.lane.b32.xlu1 %v216_v18, %s278_s3  ;;  %s287_s3 = smov 20  }
  0x26   :  { %115 = vrot.lane.b32.xlu0 %v217_v19, %s279_s8  ;;  %121 = vrot.lane.b32.xlu1 %v218_v20, %s280_s9  ;;  %s289_s9 = smov 12  }
  0x2a   :  { %127 = vrot.lane.b32.xlu0 %v219_v21, %s281_s14  ;;  %133 = vrot.lane.b32.xlu1 %v220_v22, %s282_s15 }
  0x2e   :  { %139 = vrot.lane.b32.xlu0 %v221_v23, %s283_s20  ;;  %145 = vrot.lane.b32.xlu1 %v222_v24, %s284_s21 }
  0x32   :  { %151 = vrot.lane.b32.xlu0 %v223_v25, %s285_s26  ;;  %157 = vrot.lane.b32.xlu1 %v224_v26, %s286_s27 }
  0x36   :  { %163 = vrot.lane.b32.xlu0 %v225_v27, %s287_s3  ;;  %169 = vrot.lane.b32.xlu1 %v226_v28, %s288_s4 }
  0x3a   :  { %175 = vrot.lane.b32.xlu0 %v227_v29, %s289_s9  ;;  %181 = vrot.lane.b32.xlu1 %v228_v30, %s290_s10 }
  0x3e   :  { %187 = vrot.lane.b32.xlu0 %v229_v31, %s291_s0 }
  0x74   :  { %v8_v32 = vpop.permute.xlu0 %7   ;;  %v20_v33 = vpop.permute.xlu1 %19  }
  0x75   :  { %10 = vst.msk [vmem:[#allocation0] sm:$0x1] %vm9_vm1, %v8_v32   ;;  %vm105_vm1 = vcmask 523744  }
  0x78   :  { %v14_v34 = vpop.permute.xlu0 %13   ;;  %v26_v35 = vpop.permute.xlu1 %25  }
  0x79   :  { %16 = vst.msk [vmem:[#allocation0] sm:$0x1] %vm15_vm2, %v14_v34   ;;  %vm111_vm2 = vcmask 490944  }
  0x7a   :  { %22 = vst.msk [vmem:[#allocation0] sm:$0x1] %vm21_vm3, %v20_v33   ;;  %vm117_vm3 = vcmask 458144  }
  0x7b   :  { %28 = vst.msk [vmem:[#allocation0] sm:$0x1] %vm27_vm4, %v26_v35   ;;  %vm123_vm4 = vcmask 425344  }
  0x7c   :  { %v32_v36 = vpop.permute.xlu0 %31   ;;  %v38_v37 = vpop.permute.xlu1 %37  }
  0x7d   :  { %34 = vst.msk [vmem:[#allocation0] sm:$0x1] %vm33_vm5, %v32_v36   ;;  %vm129_vm5 = vcmask 392544  }
  0x7e   :  { %40 = vst.msk [vmem:[#allocation0] sm:$0x1] %vm39_vm6, %v38_v37   ;;  %vm135_vm6 = vcmask 359744  }
  0x80   :  { %v44_v38 = vpop.permute.xlu0 %43   ;;  %v50_v39 = vpop.permute.xlu1 %49  }
  0x81   :  { %46 = vst.msk [vmem:[#allocation0] sm:$0x1] %vm45_vm7, %v44_v38   ;;  %vm141_vm7 = vcmask 326944  }
  0x82   :  { %52 = vst.msk [vmem:[#allocation0] sm:$0x1] %vm51_vm8, %v50_v39   ;;  %vm147_vm8 = vcmask 294144  }
  0x84   :  { %v56_v40 = vpop.permute.xlu0 %55   ;;  %v62_v41 = vpop.permute.xlu1 %61  }
  0x85   :  { %58 = vst.msk [vmem:[#allocation0] sm:$0x1] %vm57_vm9, %v56_v40   ;;  %vm153_vm9 = vcmask 261344  }
  0x86   :  { %64 = vst.msk [vmem:[#allocation0] sm:$0x1] %vm63_vm10, %v62_v41   ;;  %vm159_vm10 = vcmask 228544  }
  0x88   :  { %v68_v42 = vpop.permute.xlu0 %67   ;;  %v74_v43 = vpop.permute.xlu1 %73  }
  0x89   :  { %70 = vst.msk [vmem:[#allocation0] sm:$0x1] %vm69_vm11, %v68_v42   ;;  %vm165_vm11 = vcmask 195744  }
  0x8a   :  { %76 = vst.msk [vmem:[#allocation0] sm:$0x1] %vm75_vm12, %v74_v43   ;;  %vm171_vm12 = vcmask 162944  }
  0x8c   :  { %v80_v44 = vpop.permute.xlu0 %79   ;;  %v86_v45 = vpop.permute.xlu1 %85  }
  0x8d   :  { %82 = vst.msk [vmem:[#allocation0] sm:$0x1] %vm81_vm13, %v80_v44   ;;  %vm177_vm13 = vcmask 130144  }
  0x8e   :  { %88 = vst.msk [vmem:[#allocation0] sm:$0x1] %vm87_vm14, %v86_v45   ;;  %vm183_vm14 = vcmask 97344  }
  0x90   :  { %v92_v46 = vpop.permute.xlu0 %91   ;;  %v98_v47 = vpop.permute.xlu1 %97  }
  0x91   :  { %94 = vst.msk [vmem:[#allocation0] sm:$0x1] %vm93_vm15, %v92_v46   ;;  %vm189_vm15 = vcmask 64544  }
  0x92   :  { %100 = vst.msk [vmem:[#allocation0] sm:$0x1] %vm99_vm0, %v98_v47  }
  0x94   :  { %v104_v48 = vpop.permute.xlu0 %103   ;;  %v110_v49 = vpop.permute.xlu1 %109  }
  0x95   :  { %106 = vst.msk [vmem:[#allocation0] sm:$0x1] %vm105_vm1, %v104_v48  }
  0x96   :  { %112 = vst.msk [vmem:[#allocation0] sm:$0x1] %vm111_vm2, %v110_v49  }
  0x98   :  { %v116_v50 = vpop.permute.xlu0 %115   ;;  %v122_v51 = vpop.permute.xlu1 %121  }
  0x99   :  { %118 = vst.msk [vmem:[#allocation0] sm:$0x1] %vm117_vm3, %v116_v50  }
  0x9a   :  { %124 = vst.msk [vmem:[#allocation0] sm:$0x1] %vm123_vm4, %v122_v51  }
  0x9c   :  { %v128_v52 = vpop.permute.xlu0 %127   ;;  %v134_v53 = vpop.permute.xlu1 %133  }
  0x9d   :  { %130 = vst.msk [vmem:[#allocation0] sm:$0x1] %vm129_vm5, %v128_v52  }
  0x9e   :  { %136 = vst.msk [vmem:[#allocation0] sm:$0x1] %vm135_vm6, %v134_v53  }
  0xa0   :  { %v140_v54 = vpop.permute.xlu0 %139   ;;  %v146_v55 = vpop.permute.xlu1 %145  }
  0xa1   :  { %142 = vst.msk [vmem:[#allocation0] sm:$0x1] %vm141_vm7, %v140_v54  }
  0xa2   :  { %148 = vst.msk [vmem:[#allocation0] sm:$0x1] %vm147_vm8, %v146_v55  }
  0xa4   :  { %v152_v56 = vpop.permute.xlu0 %151   ;;  %v158_v57 = vpop.permute.xlu1 %157  }
  0xa5   :  { %154 = vst.msk [vmem:[#allocation0] sm:$0x1] %vm153_vm9, %v152_v56  }
  0xa6   :  { %160 = vst.msk [vmem:[#allocation0] sm:$0x1] %vm159_vm10, %v158_v57  }
  0xa8   :  { %v164_v58 = vpop.permute.xlu0 %163   ;;  %v170_v59 = vpop.permute.xlu1 %169  }
  0xa9   :  { %166 = vst.msk [vmem:[#allocation0] sm:$0x1] %vm165_vm11, %v164_v58  }
  0xaa   :  { %172 = vst.msk [vmem:[#allocation0] sm:$0x1] %vm171_vm12, %v170_v59  }
  0xac   :  { %v176_v60 = vpop.permute.xlu0 %175   ;;  %v182_v61 = vpop.permute.xlu1 %181  }
  0xad   :  { %178 = vst.msk [vmem:[#allocation0] sm:$0x1] %vm177_vm13, %v176_v60  }
  0xae   :  { %184 = vst.msk [vmem:[#allocation0] sm:$0x1] %vm183_vm14, %v182_v61  }
  0xb0   :  { %v188_v62 = vpop.permute.xlu0 %187  }
  0xb1   :  { %190 = vst.msk [vmem:[#allocation0] sm:$0x1] %vm189_vm15, %v188_v62  }
  0xb8   :  { %v195_v63 = vld [vmem:[#allocation0] sm:$0x1] }
  0xb9   :  { %198 = vst [vmem:[%s402_s1] sm:$0x1] %v195_v63 }

// kernel: mlp_forward.1
= control target key start
LH: loop header
LB: loop body
LE: loop exit
PB: predicated region body
PF: predicated region fallthrough
CT: control target
= control target key end

     0   :  { %v3125_v35 = vmov 1966171168   ;;  %v291_v37 = vlaneseq  ;;  %s4186_s1 = inlined_call_operand.vmem [shape: bf16[512,1024], index: 1, kind: input, shape index: {}]   ;;  %s4187_s0 = inlined_call_operand.vmem [shape: bf16[1,512], index: 0, kind: input, shape index: {}]   ;;  %s4188_s3 = inlined_call_operand.vmem [shape: bf16[1024,128], index: 3, kind: input, shape index: {}]   ;;  %s4189_s2 = inlined_call_operand.vmem [shape: f32[1,1024], index: 2, kind: input, shape index: {}]   ;;  %s4190_s4 = inlined_call_operand.vmem [shape: f32[1,128], index: 4, kind: input, shape index: {}]   ;;  %s4191_s5 = inlined_call_operand.vmem [shape: f32[1,128], index: 5, kind: output, shape index: {}]  }
   0x1   :  { %v78_v0 = vld [vmem:[%s4186_s1 + $0x1c0] sm:$0xff]  ;;  %v289_v36 = vunpack.c.l.s4 %v3125_v35 }
   0x2   :  { %v82_v1 = vld [vmem:[%s4186_s1 + $0x1e0] sm:$0xff]  ;;  %v3228_v47 = vshrl.u32 %v291_v37, 7 }
   0x3   :  { %v206_v2 = vld [vmem:[%s4186_s1 + $0x5c0] sm:$0xff]  ;;  %v2709_v3 = vcombine.high %v78_v0, %v82_v1  ;;  %v2708_v5 = vcombine.low %v78_v0, %v82_v1  ;;  %v290_v46 = vunpack.c.0.s8 %v289_v36 }
   0x4   :  { %v210_v4 = vld [vmem:[%s4186_s1 + $0x5e0] sm:$0xff] }
   0x5   :  { %v70_v6 = vld [vmem:[%s4186_s1 + $0x180] sm:$0xff]  ;;  %v2837_v8 = vcombine.high %v206_v2, %v210_v4  ;;  %v2836_v9 = vcombine.low %v206_v2, %v210_v4  ;;  %1629 = vmatprep.subr.bf16.mxu0 %v2709_v3  ;;  %v3243_v56 = vsub.s32 %v290_v46, %v3228_v47 }
   0x6   :  { %v74_v7 = vld [vmem:[%s4186_s1 + $0x1a0] sm:$0xff]  ;;  %1630 = vmatpush1.bf16.msra.mxu0 %v2708_v5 }
   0x7   :  { %v2701_v10 = vcombine.high %v70_v6, %v74_v7  ;;  %v198_v11 = vld [vmem:[%s4186_s1 + $0x580] sm:$0xff]  ;;  %1670 = vmatprep.subr.bf16.mxu1 %v2837_v8  ;;  %v2700_v18 = vcombine.low %v70_v6, %v74_v7 }
   0x8   :  { %v202_v12 = vld [vmem:[%s4186_s1 + $0x5a0] sm:$0xff]  ;;  %1671 = vmatpush1.bf16.msra.mxu1 %v2836_v9 }
   0x9   :  { %v62_v13 = vld [vmem:[%s4186_s1 + $0x140] sm:$0xff]  ;;  %v2829_v14 = vcombine.high %v198_v11, %v202_v12  ;;  %1631 = vmatprep.subr.bf16.mxu0 %v2701_v10  ;;  %v2828_v19 = vcombine.low %v198_v11, %v202_v12 }
   0xa   :  { %v66_v15 = vld [vmem:[%s4186_s1 + $0x160] sm:$0xff]  ;;  %1632 = vmatpush1.bf16.msra.mxu0 %v2700_v18 }
   0xb   :  { %v190_v16 = vld [vmem:[%s4186_s1 + $0x540] sm:$0xff]  ;;  %v2693_v20 = vcombine.high %v62_v13, %v66_v15  ;;  %1672 = vmatprep.subr.bf16.mxu1 %v2829_v14  ;;  %v2692_v26 = vcombine.low %v62_v13, %v66_v15 }
   0xc   :  { %v194_v17 = vld [vmem:[%s4186_s1 + $0x560] sm:$0xff]  ;;  %1673 = vmatpush1.bf16.msra.mxu1 %v2828_v19 }
   0xd   :  { %v2821_v21 = vcombine.high %v190_v16, %v194_v17  ;;  %v54_v22 = vld [vmem:[%s4186_s1 + $0x100] sm:$0xff]  ;;  %1633 = vmatprep.subr.bf16.mxu0 %v2693_v20  ;;  %v2820_v27 = vcombine.low %v190_v16, %v194_v17 }
   0xe   :  { %v58_v23 = vld [vmem:[%s4186_s1 + $0x120] sm:$0xff]  ;;  %1634 = vmatpush1.bf16.msra.mxu0 %v2692_v26 }
   0xf   :  { %v182_v24 = vld [vmem:[%s4186_s1 + $0x500] sm:$0xff]  ;;  %v2685_v28 = vcombine.high %v54_v22, %v58_v23  ;;  %1674 = vmatprep.subr.bf16.mxu1 %v2821_v21  ;;  %v2684_v34 = vcombine.low %v54_v22, %v58_v23 }
  0x10   :  { %v186_v25 = vld [vmem:[%s4186_s1 + $0x520] sm:$0xff]  ;;  %1675 = vmatpush1.bf16.msra.mxu1 %v2820_v27 }
  0x11   :  { %v2813_v29 = vcombine.high %v182_v24, %v186_v25  ;;  %v46_v30 = vld [vmem:[%s4186_s1 + $0xc0] sm:$0xff]  ;;  %1635 = vmatprep.subr.bf16.mxu0 %v2685_v28  ;;  %v2812_v38 = vcombine.low %v182_v24, %v186_v25 }
  0x12   :  { %v50_v31 = vld [vmem:[%s4186_s1 + $0xe0] sm:$0xff]  ;;  %1636 = vmatpush1.bf16.msra.mxu0 %v2684_v34 }
  0x13   :  { %v174_v32 = vld [vmem:[%s4186_s1 + $0x4c0] sm:$0xff]  ;;  %v2677_v39 = vcombine.high %v46_v30, %v50_v31  ;;  %1676 = vmatprep.subr.bf16.mxu1 %v2813_v29  ;;  %v2676_v45 = vcombine.low %v46_v30, %v50_v31 }
  0x14   :  { %v178_v33 = vld [vmem:[%s4186_s1 + $0x4e0] sm:$0xff]  ;;  %1677 = vmatpush1.bf16.msra.mxu1 %v2812_v38 }
  0x15   :  { %v2805_v40 = vcombine.high %v174_v32, %v178_v33  ;;  %v38_v41 = vld [vmem:[%s4186_s1 + $0x80] sm:$0xff]  ;;  %1637 = vmatprep.subr.bf16.mxu0 %v2677_v39  ;;  %v2804_v48 = vcombine.low %v174_v32, %v178_v33 }
  0x16   :  { %v42_v42 = vld [vmem:[%s4186_s1 + $0xa0] sm:$0xff]  ;;  %1638 = vmatpush1.bf16.msra.mxu0 %v2676_v45 }
  0x17   :  { %v166_v43 = vld [vmem:[%s4186_s1 + $0x480] sm:$0xff]  ;;  %v2669_v49 = vcombine.high %v38_v41, %v42_v42  ;;  %1678 = vmatprep.subr.bf16.mxu1 %v2805_v40  ;;  %v2668_v55 = vcombine.low %v38_v41, %v42_v42 }
  0x18   :  { %v170_v44 = vld [vmem:[%s4186_s1 + $0x4a0] sm:$0xff]  ;;  %1679 = vmatpush1.bf16.msra.mxu1 %v2804_v48 }
  0x19   :  { %v2797_v50 = vcombine.high %v166_v43, %v170_v44  ;;  %v30_v51 = vld [vmem:[%s4186_s1 + $0x40] sm:$0xff]  ;;  %1639 = vmatprep.subr.bf16.mxu0 %v2669_v49  ;;  %v2796_v57 = vcombine.low %v166_v43, %v170_v44 }
  0x1a   :  { %v34_v52 = vld [vmem:[%s4186_s1 + $0x60] sm:$0xff]  ;;  %1640 = vmatpush1.bf16.msra.mxu0 %v2668_v55 }
  0x1b   :  { %v158_v53 = vld [vmem:[%s4186_s1 + $0x440] sm:$0xff]  ;;  %v2661_v58 = vcombine.high %v30_v51, %v34_v52  ;;  %1680 = vmatprep.subr.bf16.mxu1 %v2797_v50  ;;  %v2660_v2 = vcombine.low %v30_v51, %v34_v52 }
  0x1c   :  { %v162_v54 = vld [vmem:[%s4186_s1 + $0x460] sm:$0xff]  ;;  %1681 = vmatpush1.bf16.msra.mxu1 %v2796_v57 }
  0x1d   :  { %v3248_v59 = vld.sshfl [vmem:[%s4187_s0] sm:$0x33 pattern:$0x75316420]  ;;  %v2789_v60 = vcombine.high %v158_v53, %v162_v54  ;;  %1641 = vmatprep.subr.bf16.mxu0 %v2661_v58  ;;  %v2788_v4 = vcombine.low %v158_v53, %v162_v54 }
  0x1e   :  { %v22_v61 = vld [vmem:[%s4186_s1] sm:$0xff]  ;;  %v287_v63 = vcombine.high %v3248_v59, %v3248_v59  ;;  %1642 = vmatpush1.bf16.msra.mxu0 %v2660_v2 }
  0x1f   :  { %v26_v62 = vld [vmem:[%s4186_s1 + $0x20] sm:$0xff]  ;;  %1682 = vmatprep.subr.bf16.mxu1 %v2789_v60 }
  0x20   :  { %v150_v0 = vld [vmem:[%s4186_s1 + $0x400] sm:$0xff]  ;;  %v3265_v3 = vrot.slane %v287_v63, %v3243_v56  ;;  %v2653_v5 = vcombine.high %v22_v61, %v26_v62  ;;  %v2652_v12 = vcombine.low %v22_v61, %v26_v62  ;;  %1683 = vmatpush1.bf16.msra.mxu1 %v2788_v4 }
  0x21   :  { %v154_v1 = vld [vmem:[%s4186_s1 + $0x420] sm:$0xff] }
  0x22   :  { %v2781_v6 = vcombine.high %v150_v0, %v154_v1  ;;  %v142_v7 = vld [vmem:[%s4186_s1 + $0x3c0] sm:$0xff]  ;;  %1661 = vmatprep.mubr.bf16.mxu0 %v3265_v3  ;;  %v3276_v9 = vcombine.high %v3265_v3, %v3265_v3  ;;  %1643 = vmatprep.subr.bf16.mxu0 %v2653_v5  ;;  %v2780_v13 = vcombine.low %v150_v0, %v154_v1 }
  0x23   :  { %v146_v8 = vld [vmem:[%s4186_s1 + $0x3e0] sm:$0xff]  ;;  %1644 = vmatpush1.bf16.msra.mxu0 %v2652_v12 }
  0x24   :  { %v270_v10 = vld [vmem:[%s4186_s1 + $0x7c0] sm:$0xff]  ;;  %1702 = vmatprep.mubr.bf16.mxu1 %v3276_v9  ;;  %v2773_v14 = vcombine.high %v142_v7, %v146_v8  ;;  %1684 = vmatprep.subr.bf16.mxu1 %v2781_v6  ;;  %v2772_v20 = vcombine.low %v142_v7, %v146_v8 }
  0x25   :  { %v274_v11 = vld [vmem:[%s4186_s1 + $0x7e0] sm:$0xff]  ;;  %1685 = vmatpush1.bf16.msra.mxu1 %v2780_v13  ;;  %v79_v13 = vld [vmem:[%s4186_s1 + $0x1c8] sm:$0xff] }
  0x26   :  { %v2901_v15 = vcombine.high %v270_v10, %v274_v11  ;;  %v134_v16 = vld [vmem:[%s4186_s1 + $0x380] sm:$0xff]  ;;  %1645 = vmatprep.subr.bf16.mxu0 %v2773_v14  ;;  %v2900_v21 = vcombine.low %v270_v10, %v274_v11  ;;  %v83_v14 = vld [vmem:[%s4186_s1 + $0x1e8] sm:$0xff] }
  0x27   :  { %v138_v17 = vld [vmem:[%s4186_s1 + $0x3a0] sm:$0xff]  ;;  %1646 = vmatpush2.bf16.msra.mxu0 %v2772_v20  ;;  %v2711_v20 = vcombine.high %v79_v13, %v83_v14 }
  0x28   :  { %v262_v18 = vld [vmem:[%s4186_s1 + $0x780] sm:$0xff]  ;;  %v2765_v22 = vcombine.high %v134_v16, %v138_v17  ;;  %1686 = vmatprep.subr.bf16.mxu1 %v2901_v15  ;;  %v2764_v28 = vcombine.low %v134_v16, %v138_v17  ;;  %v207_v15 = vld [vmem:[%s4186_s1 + $0x5c8] sm:$0xff] }
  0x29   :  { %v266_v19 = vld [vmem:[%s4186_s1 + $0x7a0] sm:$0xff]  ;;  %1687 = vmatpush2.bf16.msra.mxu1 %v2900_v21  ;;  %v211_v16 = vld [vmem:[%s4186_s1 + $0x5e8] sm:$0xff] }
  0x2a   :  { %v2893_v23 = vcombine.high %v262_v18, %v266_v19  ;;  %v126_v24 = vld [vmem:[%s4186_s1 + $0x340] sm:$0xff]  ;;  %1647 = vmatprep.subr.bf16.mxu0 %v2765_v22  ;;  %v2892_v29 = vcombine.low %v262_v18, %v266_v19  ;;  %v3383_v18 = vrot.slane %v3248_v59, %v3243_v56  ;;  %v2839_v21 = vcombine.high %v207_v15, %v211_v16  ;;  %v71_v22 = vld [vmem:[%s4186_s1 + $0x188] sm:$0xff] }
  0x2b   :  { %v130_v25 = vld [vmem:[%s4186_s1 + $0x360] sm:$0xff]  ;;  %1648 = vmatpush2.bf16.msra.mxu0 %v2764_v28  ;;  %v203_v56 = vld [vmem:[%s4186_s1 + $0x5a8] sm:$0xff] }
  0x2c   :  { %v254_v26 = vld [vmem:[%s4186_s1 + $0x740] sm:$0xff]  ;;  %v2757_v30 = vcombine.high %v126_v24, %v130_v25  ;;  %1688 = vmatprep.subr.bf16.mxu1 %v2893_v23  ;;  %v2756_v36 = vcombine.low %v126_v24, %v130_v25  ;;  %v75_v23 = vld [vmem:[%s4186_s1 + $0x1a8] sm:$0xff]  ;;  %v3399_v59 = vcombine.high %v3383_v18, %v3383_v18  ;;  %v2710_v25 = vcombine.low %v79_v13, %v83_v14 }
  0x2d   :  { %v258_v27 = vld [vmem:[%s4186_s1 + $0x760] sm:$0xff]  ;;  %1689 = vmatpush2.bf16.msra.mxu1 %v2892_v29  ;;  %v199_v24 = vld [vmem:[%s4186_s1 + $0x588] sm:$0xff] }
  0x2e   :  { %v2885_v31 = vcombine.high %v254_v26, %v258_v27  ;;  %v118_v32 = vld [vmem:[%s4186_s1 + $0x300] sm:$0xff]  ;;  %1649 = vmatprep.subr.bf16.mxu0 %v2757_v30  ;;  %v2884_v37 = vcombine.low %v254_v26, %v258_v27  ;;  %v2838_v26 = vcombine.low %v207_v15, %v211_v16  ;;  %v2703_v27 = vcombine.high %v71_v22, %v75_v23  ;;  %v63_v29 = vld [vmem:[%s4186_s1 + $0x148] sm:$0xff] }
  0x2f   :  { %v122_v33 = vld [vmem:[%s4186_s1 + $0x320] sm:$0xff]  ;;  %1650 = vmatpush2.bf16.msra.mxu0 %v2756_v36  ;;  %v2831_v28 = vcombine.high %v199_v24, %v203_v56  ;;  %v67_v30 = vld [vmem:[%s4186_s1 + $0x168] sm:$0xff] }
  0x30   :  { %v246_v34 = vld [vmem:[%s4186_s1 + $0x700] sm:$0xff]  ;;  %v2749_v38 = vcombine.high %v118_v32, %v122_v33  ;;  %1690 = vmatprep.subr.bf16.mxu1 %v2885_v31  ;;  %v2748_v44 = vcombine.low %v118_v32, %v122_v33  ;;  %v191_v31 = vld [vmem:[%s4186_s1 + $0x548] sm:$0xff]  ;;  %v2702_v33 = vcombine.low %v71_v22, %v75_v23 }
  0x31   :  { %v250_v35 = vld [vmem:[%s4186_s1 + $0x720] sm:$0xff]  ;;  %1691 = vmatpush2.bf16.msra.mxu1 %v2884_v37  ;;  %v195_v32 = vld [vmem:[%s4186_s1 + $0x568] sm:$0xff] }
  0x32   :  { %v2877_v39 = vcombine.high %v246_v34, %v250_v35  ;;  %v110_v40 = vld [vmem:[%s4186_s1 + $0x2c0] sm:$0xff]  ;;  %1651 = vmatprep.subr.bf16.mxu0 %v2749_v38  ;;  %v2876_v45 = vcombine.low %v246_v34, %v250_v35  ;;  %v2830_v34 = vcombine.low %v199_v24, %v203_v56  ;;  %v2695_v35 = vcombine.high %v63_v29, %v67_v30  ;;  %v55_v37 = vld [vmem:[%s4186_s1 + $0x108] sm:$0xff] }
  0x33   :  { %v114_v41 = vld [vmem:[%s4186_s1 + $0x2e0] sm:$0xff]  ;;  %1652 = vmatpush2.bf16.msra.mxu0 %v2748_v44  ;;  %v2823_v36 = vcombine.high %v191_v31, %v195_v32  ;;  %v59_v38 = vld [vmem:[%s4186_s1 + $0x128] sm:$0xff] }
  0x34   :  { %v238_v42 = vld [vmem:[%s4186_s1 + $0x6c0] sm:$0xff]  ;;  %v2741_v46 = vcombine.high %v110_v40, %v114_v41  ;;  %1692 = vmatprep.subr.bf16.mxu1 %v2877_v39  ;;  %v2740_v53 = vcombine.low %v110_v40, %v114_v41  ;;  %v183_v39 = vld [vmem:[%s4186_s1 + $0x508] sm:$0xff]  ;;  %v2694_v41 = vcombine.low %v63_v29, %v67_v30 }
  0x35   :  { %v242_v43 = vld [vmem:[%s4186_s1 + $0x6e0] sm:$0xff]  ;;  %1693 = vmatpush2.bf16.msra.mxu1 %v2876_v45  ;;  %v187_v40 = vld [vmem:[%s4186_s1 + $0x528] sm:$0xff] }
  0x36   :  { %v2869_v48 = vcombine.high %v238_v42, %v242_v43  ;;  %v102_v49 = vld [vmem:[%s4186_s1 + $0x280] sm:$0xff]  ;;  %1653 = vmatprep.subr.bf16.mxu0 %v2741_v46  ;;  %v2868_v54 = vcombine.low %v238_v42, %v242_v43  ;;  %v2822_v42 = vcombine.low %v191_v31, %v195_v32  ;;  %v2687_v43 = vcombine.high %v55_v37, %v59_v38  ;;  %v47_v45 = vld [vmem:[%s4186_s1 + $0xc8] sm:$0xff] }
  0x37   :  { %v106_v50 = vld [vmem:[%s4186_s1 + $0x2a0] sm:$0xff]  ;;  %1654 = vmatpush2.bf16.msra.mxu0 %v2740_v53  ;;  %v2815_v44 = vcombine.high %v183_v39, %v187_v40  ;;  %v51_v46 = vld [vmem:[%s4186_s1 + $0xe8] sm:$0xff] }
  0x38   :  { %v230_v51 = vld [vmem:[%s4186_s1 + $0x680] sm:$0xff]  ;;  %v2733_v55 = vcombine.high %v102_v49, %v106_v50  ;;  %1694 = vmatprep.subr.bf16.mxu1 %v2869_v48  ;;  %v2732_v63 = vcombine.low %v102_v49, %v106_v50  ;;  %v175_v48 = vld [vmem:[%s4186_s1 + $0x4c8] sm:$0xff]  ;;  %v2686_v50 = vcombine.low %v55_v37, %v59_v38 }
  0x39   :  { %v234_v52 = vld [vmem:[%s4186_s1 + $0x6a0] sm:$0xff]  ;;  %1695 = vmatpush2.bf16.msra.mxu1 %v2868_v54  ;;  %v179_v49 = vld [vmem:[%s4186_s1 + $0x4e8] sm:$0xff] }
  0x3a   :  { %v2861_v57 = vcombine.high %v230_v51, %v234_v52  ;;  %v94_v58 = vld [vmem:[%s4186_s1 + $0x240] sm:$0xff]  ;;  %1655 = vmatprep.subr.bf16.mxu0 %v2733_v55  ;;  %v2860_v0 = vcombine.low %v230_v51, %v234_v52  ;;  %v2814_v51 = vcombine.low %v183_v39, %v187_v40  ;;  %v2679_v52 = vcombine.high %v47_v45, %v51_v46  ;;  %v39_v54 = vld [vmem:[%s4186_s1 + $0x88] sm:$0xff] }
  0x3b   :  { %v98_v60 = vld [vmem:[%s4186_s1 + $0x260] sm:$0xff]  ;;  %1656 = vmatpush2.bf16.msra.mxu0 %v2732_v63  ;;  %v2807_v53 = vcombine.high %v175_v48, %v179_v49  ;;  %v43_v55 = vld [vmem:[%s4186_s1 + $0xa8] sm:$0xff] }
  0x3c   :  { %v222_v61 = vld [vmem:[%s4186_s1 + $0x640] sm:$0xff]  ;;  %v2725_v1 = vcombine.high %v94_v58, %v98_v60  ;;  %1696 = vmatprep.subr.bf16.mxu1 %v2861_v57  ;;  %v2724_v8 = vcombine.low %v94_v58, %v98_v60  ;;  %v167_v57 = vld [vmem:[%s4186_s1 + $0x488] sm:$0xff]  ;;  %v2678_v60 = vcombine.low %v47_v45, %v51_v46 }
  0x3d   :  { %v226_v62 = vld [vmem:[%s4186_s1 + $0x660] sm:$0xff]  ;;  %1697 = vmatpush2.bf16.msra.mxu1 %v2860_v0  ;;  %v171_v58 = vld [vmem:[%s4186_s1 + $0x4a8] sm:$0xff] }
  0x3e   :  { %v2853_v2 = vcombine.high %v222_v61, %v226_v62  ;;  %v86_v4 = vld [vmem:[%s4186_s1 + $0x200] sm:$0xff]  ;;  %1657 = vmatprep.subr.bf16.mxu0 %v2725_v1  ;;  %v2852_v10 = vcombine.low %v222_v61, %v226_v62  ;;  %v2806_v61 = vcombine.low %v175_v48, %v179_v49  ;;  %v2671_v62 = vcombine.high %v39_v54, %v43_v55  ;;  %v31_v0 = vld [vmem:[%s4186_s1 + $0x48] sm:$0xff] }
  0x3f   :  { %v90_v5 = vld [vmem:[%s4186_s1 + $0x220] sm:$0xff]  ;;  %1658 = vmatpush2.bf16.msra.mxu0 %v2724_v8  ;;  %v2799_v63 = vcombine.high %v167_v57, %v171_v58  ;;  %v35_v1 = vld [vmem:[%s4186_s1 + $0x68] sm:$0xff] }
  0x40   :  { %v214_v6 = vld [vmem:[%s4186_s1 + $0x600] sm:$0xff]  ;;  %v2717_v11 = vcombine.high %v86_v4, %v90_v5  ;;  %1698 = vmatprep.subr.bf16.mxu1 %v2853_v2  ;;  %v2716_v17 = vcombine.low %v86_v4, %v90_v5  ;;  %v159_v2 = vld [vmem:[%s4186_s1 + $0x448] sm:$0xff]  ;;  %v2670_v5 = vcombine.low %v39_v54, %v43_v55  ;;  %v2662_v14 = vcombine.low %v31_v0, %v35_v1 }
  0x41   :  { %v218_v7 = vld [vmem:[%s4186_s1 + $0x620] sm:$0xff]  ;;  %1699 = vmatpush2.bf16.msra.mxu1 %v2852_v10  ;;  %v163_v4 = vld [vmem:[%s4186_s1 + $0x468] sm:$0xff] }
  0x42   :  { %v2845_v12 = vcombine.high %v214_v6, %v218_v7  ;;  %1659 = vmatprep.subr.bf16.mxu0 %v2717_v11  ;;  %v2844_v19 = vcombine.low %v214_v6, %v218_v7  ;;  %v2798_v6 = vcombine.low %v167_v57, %v171_v58  ;;  %v2663_v7 = vcombine.high %v31_v0, %v35_v1  ;;  %v23_v10 = vld [vmem:[%s4186_s1 + $0x8] sm:$0xff] }
  0x43   :  { %1660 = vmatpush2.bf16.msra.mxu0 %v2716_v17  ;;  %v2791_v8 = vcombine.high %v159_v2, %v163_v4  ;;  %v27_v11 = vld [vmem:[%s4186_s1 + $0x28] sm:$0xff]  ;;  %v2790_v15 = vcombine.low %v159_v2, %v163_v4 }
  0x44   :  { %1700 = vmatprep.subr.bf16.mxu1 %v2845_v12  ;;  %1711 = vmatprep.subr.bf16.mxu0 %v2711_v20  ;;  %v151_v12 = vld [vmem:[%s4186_s1 + $0x408] sm:$0xff]  ;;  %v2655_v16 = vcombine.high %v23_v10, %v27_v11  ;;  %v2654_v23 = vcombine.low %v23_v10, %v27_v11 }
  0x45   :  { %1701 = vmatpush2.bf16.msra.mxu1 %v2844_v19  ;;  %v155_v13 = vld [vmem:[%s4186_s1 + $0x428] sm:$0xff] }
  0x46   :  { %1752 = vmatprep.subr.bf16.mxu1 %v2839_v21  ;;  %1662 = vmatmul.mubr.bf16.vlgmr.msra.gmra.mxu0 %v3383_v18  ;;  %v2783_v17 = vcombine.high %v151_v12, %v155_v13  ;;  %v143_v19 = vld [vmem:[%s4186_s1 + $0x3c8] sm:$0xff]  ;;  %v2782_v24 = vcombine.low %v151_v12, %v155_v13 }
  0x47   :  { %1712 = vmatpush1.bf16.msra.mxu0 %v2710_v25  ;;  %1743 = vmatprep.mubr.bf16.mxu0 %v3265_v3  ;;  %v147_v20 = vld [vmem:[%s4186_s1 + $0x3e8] sm:$0xff] }
  0x48   :  { %1703 = vmatmul.mubr.bf16.vlgmr.msra.gmra.mxu1 %v3399_v59  ;;  %1713 = vmatprep.subr.bf16.mxu0 %v2703_v27  ;;  %v271_v21 = vld [vmem:[%s4186_s1 + $0x7c8] sm:$0xff]  ;;  %v2775_v56 = vcombine.high %v143_v19, %v147_v20  ;;  %v2774_v30 = vcombine.low %v143_v19, %v147_v20 }
  0x49   :  { %1753 = vmatpush1.bf16.msra.mxu1 %v2838_v26  ;;  %1784 = vmatprep.mubr.bf16.mxu1 %v3276_v9  ;;  %v275_v22 = vld [vmem:[%s4186_s1 + $0x7e8] sm:$0xff] }
  0x4a   :  { %1754 = vmatprep.subr.bf16.mxu1 %v2831_v28  ;;  %v2903_v25 = vcombine.high %v271_v21, %v275_v22  ;;  %v135_v26 = vld [vmem:[%s4186_s1 + $0x388] sm:$0xff]  ;;  %v2902_v31 = vcombine.low %v271_v21, %v275_v22 }
  0x4b   :  { %1714 = vmatpush1.bf16.msra.mxu0 %v2702_v33  ;;  %v139_v27 = vld [vmem:[%s4186_s1 + $0x3a8] sm:$0xff] }
  0x4c   :  { %1715 = vmatprep.subr.bf16.mxu0 %v2695_v35  ;;  %v263_v28 = vld [vmem:[%s4186_s1 + $0x788] sm:$0xff]  ;;  %v2767_v32 = vcombine.high %v135_v26, %v139_v27  ;;  %v2766_v38 = vcombine.low %v135_v26, %v139_v27  ;;  %v212_v26 = vld [vmem:[%s4186_s1 + $0x5f0] sm:$0xff] }
  0x4d   :  { %1755 = vmatpush1.bf16.msra.mxu1 %v2830_v34  ;;  %v267_v29 = vld [vmem:[%s4186_s1 + $0x7a8] sm:$0xff] }
  0x4e   :  { %1756 = vmatprep.subr.bf16.mxu1 %v2823_v36  ;;  %v2895_v33 = vcombine.high %v263_v28, %v267_v29  ;;  %v127_v34 = vld [vmem:[%s4186_s1 + $0x348] sm:$0xff]  ;;  %v2894_v39 = vcombine.low %v263_v28, %v267_v29 }
  0x4f   :  { %1716 = vmatpush1.bf16.msra.mxu0 %v2694_v41  ;;  %v131_v35 = vld [vmem:[%s4186_s1 + $0x368] sm:$0xff] }
  0x50   :  { %1717 = vmatprep.subr.bf16.mxu0 %v2687_v43  ;;  %v255_v36 = vld [vmem:[%s4186_s1 + $0x748] sm:$0xff]  ;;  %v2759_v40 = vcombine.high %v127_v34, %v131_v35  ;;  %v2758_v46 = vcombine.low %v127_v34, %v131_v35  ;;  %v204_v34 = vld [vmem:[%s4186_s1 + $0x5b0] sm:$0xff] }
  0x51   :  { %1757 = vmatpush1.bf16.msra.mxu1 %v2822_v42  ;;  %v259_v37 = vld [vmem:[%s4186_s1 + $0x768] sm:$0xff] }
  0x52   :  { %1758 = vmatprep.subr.bf16.mxu1 %v2815_v44  ;;  %v2887_v41 = vcombine.high %v255_v36, %v259_v37  ;;  %v119_v42 = vld [vmem:[%s4186_s1 + $0x308] sm:$0xff]  ;;  %v2886_v48 = vcombine.low %v255_v36, %v259_v37 }
  0x53   :  { %1718 = vmatpush1.bf16.msra.mxu0 %v2686_v50  ;;  %v123_v43 = vld [vmem:[%s4186_s1 + $0x328] sm:$0xff] }
  0x54   :  { %1719 = vmatprep.subr.bf16.mxu0 %v2679_v52  ;;  %v247_v44 = vld [vmem:[%s4186_s1 + $0x708] sm:$0xff]  ;;  %v2751_v49 = vcombine.high %v119_v42, %v123_v43  ;;  %v2750_v55 = vcombine.low %v119_v42, %v123_v43  ;;  %v196_v42 = vld [vmem:[%s4186_s1 + $0x570] sm:$0xff] }
  0x55   :  { %1759 = vmatpush1.bf16.msra.mxu1 %v2814_v51  ;;  %v251_v45 = vld [vmem:[%s4186_s1 + $0x728] sm:$0xff] }
  0x56   :  { %1760 = vmatprep.subr.bf16.mxu1 %v2807_v53  ;;  %v2879_v50 = vcombine.high %v247_v44, %v251_v45  ;;  %v111_v51 = vld [vmem:[%s4186_s1 + $0x2c8] sm:$0xff]  ;;  %v2878_v57 = vcombine.low %v247_v44, %v251_v45  ;;  %v56_v44 = vld [vmem:[%s4186_s1 + $0x110] sm:$0xff] }
  0x57   :  { %1720 = vmatpush1.bf16.msra.mxu0 %v2678_v60  ;;  %v115_v52 = vld [vmem:[%s4186_s1 + $0x2e8] sm:$0xff]  ;;  %v60_v45 = vld [vmem:[%s4186_s1 + $0x130] sm:$0xff] }
  0x58   :  { %1721 = vmatprep.subr.bf16.mxu0 %v2671_v62  ;;  %v239_v53 = vld [vmem:[%s4186_s1 + $0x6c8] sm:$0xff]  ;;  %v2743_v58 = vcombine.high %v111_v51, %v115_v52  ;;  %v2742_v1 = vcombine.low %v111_v51, %v115_v52  ;;  %v188_v51 = vld [vmem:[%s4186_s1 + $0x530] sm:$0xff] }
  0x59   :  { %1761 = vmatpush1.bf16.msra.mxu1 %v2806_v61  ;;  %v243_v54 = vld [vmem:[%s4186_s1 + $0x6e8] sm:$0xff] }
  0x5a   :  { %1762 = vmatprep.subr.bf16.mxu1 %v2799_v63  ;;  %v2871_v60 = vcombine.high %v239_v53, %v243_v54  ;;  %v103_v61 = vld [vmem:[%s4186_s1 + $0x288] sm:$0xff]  ;;  %v2870_v2 = vcombine.low %v239_v53, %v243_v54  ;;  %v48_v53 = vld [vmem:[%s4186_s1 + $0xd0] sm:$0xff] }
  0x5b   :  { %1722 = vmatpush1.bf16.msra.mxu0 %v2670_v5  ;;  %v107_v62 = vld [vmem:[%s4186_s1 + $0x2a8] sm:$0xff]  ;;  %v52_v54 = vld [vmem:[%s4186_s1 + $0xf0] sm:$0xff] }
  0x5c   :  { %1723 = vmatprep.subr.bf16.mxu0 %v2663_v7  ;;  %v231_v63 = vld [vmem:[%s4186_s1 + $0x688] sm:$0xff]  ;;  %v2735_v4 = vcombine.high %v103_v61, %v107_v62  ;;  %v2734_v11 = vcombine.low %v103_v61, %v107_v62  ;;  %v180_v61 = vld [vmem:[%s4186_s1 + $0x4f0] sm:$0xff]  ;;  %v2688_v62 = vcombine.low %v56_v44, %v60_v45 }
  0x5d   :  { %1763 = vmatpush1.bf16.msra.mxu1 %v2798_v6  ;;  %v235_v0 = vld [vmem:[%s4186_s1 + $0x6a8] sm:$0xff] }
  0x5e   :  { %1764 = vmatprep.subr.bf16.mxu1 %v2791_v8  ;;  %v2863_v5 = vcombine.high %v231_v63, %v235_v0  ;;  %v95_v6 = vld [vmem:[%s4186_s1 + $0x248] sm:$0xff]  ;;  %v2862_v12 = vcombine.low %v231_v63, %v235_v0  ;;  %v40_v63 = vld [vmem:[%s4186_s1 + $0x90] sm:$0xff] }
  0x5f   :  { %1724 = vmatpush1.bf16.msra.mxu0 %v2662_v14  ;;  %v99_v7 = vld [vmem:[%s4186_s1 + $0x268] sm:$0xff]  ;;  %v44_v0 = vld [vmem:[%s4186_s1 + $0xb0] sm:$0xff] }
  0x60   :  { %1725 = vmatprep.subr.bf16.mxu0 %v2655_v16  ;;  %v223_v8 = vld [vmem:[%s4186_s1 + $0x648] sm:$0xff]  ;;  %v2727_v13 = vcombine.high %v95_v6, %v99_v7  ;;  %v2726_v20 = vcombine.low %v95_v6, %v99_v7  ;;  %v172_v6 = vld [vmem:[%s4186_s1 + $0x4b0] sm:$0xff]  ;;  %v2680_v7 = vcombine.low %v48_v53, %v52_v54 }
  0x61   :  { %1765 = vmatpush1.bf16.msra.mxu1 %v2790_v15  ;;  %v227_v10 = vld [vmem:[%s4186_s1 + $0x668] sm:$0xff] }
  0x62   :  { %1766 = vmatprep.subr.bf16.mxu1 %v2783_v17  ;;  %v2855_v14 = vcombine.high %v223_v8, %v227_v10  ;;  %v87_v15 = vld [vmem:[%s4186_s1 + $0x208] sm:$0xff]  ;;  %v2854_v21 = vcombine.low %v223_v8, %v227_v10  ;;  %v32_v8 = vld [vmem:[%s4186_s1 + $0x50] sm:$0xff] }
  0x63   :  { %1726 = vmatpush1.bf16.msra.mxu0 %v2654_v23  ;;  %v91_v16 = vld [vmem:[%s4186_s1 + $0x228] sm:$0xff]  ;;  %v36_v10 = vld [vmem:[%s4186_s1 + $0x70] sm:$0xff] }
  0x64   :  { %1727 = vmatprep.subr.bf16.mxu0 %v2775_v56  ;;  %v215_v17 = vld [vmem:[%s4186_s1 + $0x608] sm:$0xff]  ;;  %v2719_v22 = vcombine.high %v87_v15, %v91_v16  ;;  %v84_v56 = vld [vmem:[%s4186_s1 + $0x1f0] sm:$0xff]  ;;  %v2718_v27 = vcombine.low %v87_v15, %v91_v16  ;;  %v2672_v16 = vcombine.low %v40_v63, %v44_v0 }
  0x65   :  { %1767 = vmatpush1.bf16.msra.mxu1 %v2782_v24  ;;  %v219_v19 = vld [vmem:[%s4186_s1 + $0x628] sm:$0xff]  ;;  %v80_v24 = vld [vmem:[%s4186_s1 + $0x1d0] sm:$0xff] }
  0x66   :  { %1768 = vmatprep.subr.bf16.mxu1 %v2903_v25  ;;  %v2847_v23 = vcombine.high %v215_v17, %v219_v19  ;;  %v208_v25 = vld [vmem:[%s4186_s1 + $0x5d0] sm:$0xff]  ;;  %v2846_v28 = vcombine.low %v215_v17, %v219_v19  ;;  %v2713_v29 = vcombine.high %v80_v24, %v84_v56  ;;  %v2712_v35 = vcombine.low %v80_v24, %v84_v56 }
  0x67   :  { %1728 = vmatpush2.bf16.msra.mxu0 %v2774_v30  ;;  %v2841_v30 = vcombine.high %v208_v25, %v212_v26  ;;  %v2840_v36 = vcombine.low %v208_v25, %v212_v26  ;;  %v24_v17 = vld [vmem:[%s4186_s1 + $0x10] sm:$0xff]  ;;  %v2664_v56 = vcombine.low %v32_v8, %v36_v10 }
  0x68   :  { %1729 = vmatprep.subr.bf16.mxu0 %v2767_v32  ;;  %v76_v32 = vld [vmem:[%s4186_s1 + $0x1b0] sm:$0xff] }
  0x69   :  { %1769 = vmatpush2.bf16.msra.mxu1 %v2902_v31  ;;  %v72_v31 = vld [vmem:[%s4186_s1 + $0x190] sm:$0xff] }
  0x6a   :  { %1770 = vmatprep.subr.bf16.mxu1 %v2895_v33  ;;  %v200_v33 = vld [vmem:[%s4186_s1 + $0x590] sm:$0xff]  ;;  %v2705_v37 = vcombine.high %v72_v31, %v76_v32  ;;  %v2704_v43 = vcombine.low %v72_v31, %v76_v32 }
  0x6b   :  { %1730 = vmatpush2.bf16.msra.mxu0 %v2766_v38  ;;  %v64_v38 = vld [vmem:[%s4186_s1 + $0x150] sm:$0xff] }
  0x6c   :  { %1731 = vmatprep.subr.bf16.mxu0 %v2759_v40  ;;  %v2833_v40 = vcombine.high %v200_v33, %v204_v34  ;;  %v28_v19 = vld [vmem:[%s4186_s1 + $0x30] sm:$0xff] }
  0x6d   :  { %1771 = vmatpush2.bf16.msra.mxu1 %v2894_v39  ;;  %v68_v39 = vld [vmem:[%s4186_s1 + $0x170] sm:$0xff]  ;;  %v2656_v32 = vcombine.low %v24_v17, %v28_v19 }
  0x6e   :  { %1772 = vmatprep.subr.bf16.mxu1 %v2887_v41  ;;  %v192_v41 = vld [vmem:[%s4186_s1 + $0x550] sm:$0xff]  ;;  %v2696_v52 = vcombine.low %v64_v38, %v68_v39 }
  0x6f   :  { %1732 = vmatpush2.bf16.msra.mxu0 %v2758_v46  ;;  %v2832_v46 = vcombine.low %v200_v33, %v204_v34  ;;  %v144_v25 = vld [vmem:[%s4186_s1 + $0x3d0] sm:$0xff] }
  0x70   :  { %1733 = vmatprep.subr.bf16.mxu0 %v2751_v49  ;;  %v2825_v49 = vcombine.high %v192_v41, %v196_v42  ;;  %v148_v26 = vld [vmem:[%s4186_s1 + $0x3f0] sm:$0xff] }
  0x71   :  { %1773 = vmatpush2.bf16.msra.mxu1 %v2886_v48  ;;  %v2697_v48 = vcombine.high %v64_v38, %v68_v39  ;;  %v136_v33 = vld [vmem:[%s4186_s1 + $0x390] sm:$0xff] }
  0x72   :  { %1774 = vmatprep.subr.bf16.mxu1 %v2879_v50  ;;  %v184_v50 = vld [vmem:[%s4186_s1 + $0x510] sm:$0xff] }
  0x73   :  { %1734 = vmatpush2.bf16.msra.mxu0 %v2750_v55  ;;  %v2824_v55 = vcombine.low %v192_v41, %v196_v42  ;;  %v140_v34 = vld [vmem:[%s4186_s1 + $0x3b0] sm:$0xff] }
  0x74   :  { %1735 = vmatprep.subr.bf16.mxu0 %v2743_v58  ;;  %v2817_v58 = vcombine.high %v184_v50, %v188_v51  ;;  %v268_v38 = vld [vmem:[%s4186_s1 + $0x7b0] sm:$0xff] }
  0x75   :  { %1775 = vmatpush2.bf16.msra.mxu1 %v2878_v57  ;;  %v2689_v57 = vcombine.high %v56_v44, %v60_v45  ;;  %v128_v41 = vld [vmem:[%s4186_s1 + $0x350] sm:$0xff]  ;;  %v2769_v44 = vcombine.high %v136_v33, %v140_v34 }
  0x76   :  { %1776 = vmatprep.subr.bf16.mxu1 %v2871_v60  ;;  %v176_v60 = vld [vmem:[%s4186_s1 + $0x4d0] sm:$0xff] }
  0x77   :  { %1736 = vmatpush2.bf16.msra.mxu0 %v2742_v1  ;;  %v2816_v1 = vcombine.low %v184_v50, %v188_v51  ;;  %v132_v42 = vld [vmem:[%s4186_s1 + $0x370] sm:$0xff] }
  0x78   :  { %1737 = vmatprep.subr.bf16.mxu0 %v2735_v4  ;;  %v2809_v4 = vcombine.high %v176_v60, %v180_v61  ;;  %v2761_v51 = vcombine.high %v128_v41, %v132_v42 }
  0x79   :  { %1777 = vmatpush2.bf16.msra.mxu1 %v2870_v2  ;;  %v2681_v2 = vcombine.high %v48_v53, %v52_v54  ;;  %v124_v53 = vld [vmem:[%s4186_s1 + $0x330] sm:$0xff] }
  0x7a   :  { %1778 = vmatprep.subr.bf16.mxu1 %v2863_v5  ;;  %v168_v5 = vld [vmem:[%s4186_s1 + $0x490] sm:$0xff] }
  0x7b   :  { %1738 = vmatpush2.bf16.msra.mxu0 %v2734_v11  ;;  %v2808_v11 = vcombine.low %v176_v60, %v180_v61  ;;  %v2801_v15 = vcombine.high %v168_v5, %v172_v6  ;;  %v248_v54 = vld [vmem:[%s4186_s1 + $0x710] sm:$0xff] }
  0x7c   :  { %1739 = vmatprep.subr.bf16.mxu0 %v2727_v13  ;;  %v160_v13 = vld [vmem:[%s4186_s1 + $0x450] sm:$0xff] }
  0x7d   :  { %1779 = vmatpush2.bf16.msra.mxu1 %v2862_v12  ;;  %v2673_v12 = vcombine.high %v40_v63, %v44_v0  ;;  %v112_v60 = vld [vmem:[%s4186_s1 + $0x2d0] sm:$0xff] }
  0x7e   :  { %1780 = vmatprep.subr.bf16.mxu1 %v2855_v14  ;;  %v164_v14 = vld [vmem:[%s4186_s1 + $0x470] sm:$0xff] }
  0x7f   :  { %1740 = vmatpush2.bf16.msra.mxu0 %v2726_v20  ;;  %v2800_v20 = vcombine.low %v168_v5, %v172_v6  ;;  %v2793_v24 = vcombine.high %v160_v13, %v164_v14  ;;  %v116_v61 = vld [vmem:[%s4186_s1 + $0x2f0] sm:$0xff] }
  0x80   :  { %1741 = vmatprep.subr.bf16.mxu0 %v2719_v22  ;;  %v152_v22 = vld [vmem:[%s4186_s1 + $0x410] sm:$0xff] }
  0x81   :  { %1781 = vmatpush2.bf16.msra.mxu1 %v2854_v21  ;;  %v2665_v21 = vcombine.high %v32_v8, %v36_v10  ;;  %v240_v0 = vld [vmem:[%s4186_s1 + $0x6d0] sm:$0xff]  ;;  %v2745_v8 = vcombine.high %v112_v60, %v116_v61 }
  0x82   :  { %1782 = vmatprep.subr.bf16.mxu1 %v2847_v23  ;;  %v156_v23 = vld [vmem:[%s4186_s1 + $0x430] sm:$0xff] }
  0x83   :  { %1742 = vmatpush2.bf16.msra.mxu0 %v2718_v27  ;;  %v2792_v27 = vcombine.low %v160_v13, %v164_v14  ;;  %v2785_v31 = vcombine.high %v152_v22, %v156_v23  ;;  %v104_v5 = vld [vmem:[%s4186_s1 + $0x290] sm:$0xff]  ;;  %v2744_v13 = vcombine.low %v112_v60, %v116_v61  ;;  %v57_v60 = vld [vmem:[%s4186_s1 + $0x118] sm:$0xff] }
  0x84   :  { %1793 = vmatprep.subr.bf16.mxu0 %v2713_v29  ;;  %v272_v29 = vld [vmem:[%s4186_s1 + $0x7d0] sm:$0xff]  ;;  %v61_v61 = vld [vmem:[%s4186_s1 + $0x138] sm:$0xff] }
  0x85   :  { %1783 = vmatpush2.bf16.msra.mxu1 %v2846_v28  ;;  %v2657_v28 = vcombine.high %v24_v17, %v28_v19  ;;  %v108_v6 = vld [vmem:[%s4186_s1 + $0x2b0] sm:$0xff] }
  0x86   :  { %1834 = vmatprep.subr.bf16.mxu1 %v2841_v30  ;;  %1744 = vmatmul.mubr.bf16.vlgmr.msra.gmra.mxu0 %v3383_v18  ;;  %v276_v30 = vld [vmem:[%s4186_s1 + $0x7f0] sm:$0xff]  ;;  %v2737_v17 = vcombine.high %v104_v5, %v108_v6 }
  0x87   :  { %1794 = vmatpush1.bf16.msra.mxu0 %v2712_v35  ;;  %1825 = vmatprep.mubr.bf16.mxu0 %v3265_v3  ;;  %v2784_v35 = vcombine.low %v152_v22, %v156_v23  ;;  %v2905_v39 = vcombine.high %v272_v29, %v276_v30  ;;  %v232_v10 = vld [vmem:[%s4186_s1 + $0x690] sm:$0xff]  ;;  %v2736_v22 = vcombine.low %v104_v5, %v108_v6  ;;  %v53_v5 = vld [vmem:[%s4186_s1 + $0xf8] sm:$0xff] }
  0x88   :  { %1785 = vmatmul.mubr.bf16.vlgmr.msra.gmra.mxu1 %v3399_v59  ;;  %1795 = vmatprep.subr.bf16.mxu0 %v2705_v37  ;;  %v264_v37 = vld [vmem:[%s4186_s1 + $0x790] sm:$0xff]  ;;  %v181_v6 = vld [vmem:[%s4186_s1 + $0x4f8] sm:$0xff] }
  0x89   :  { %1835 = vmatpush1.bf16.msra.mxu1 %v2840_v36  ;;  %1866 = vmatprep.mubr.bf16.mxu1 %v3276_v9  ;;  %v2777_v36 = vcombine.high %v144_v25, %v148_v26  ;;  %v2897_v45 = vcombine.high %v264_v37, %v268_v38  ;;  %v2896_v50 = vcombine.low %v264_v37, %v268_v38  ;;  %v96_v14 = vld [vmem:[%s4186_s1 + $0x250] sm:$0xff] }
  0x8a   :  { %1836 = vmatprep.subr.bf16.mxu1 %v2833_v40  ;;  %v2776_v40 = vcombine.low %v144_v25, %v148_v26  ;;  %v224_v19 = vld [vmem:[%s4186_s1 + $0x650] sm:$0xff] }
  0x8b   :  { %1796 = vmatpush1.bf16.msra.mxu0 %v2704_v43  ;;  %v2904_v43 = vcombine.low %v272_v29, %v276_v30  ;;  %v88_v25 = vld [vmem:[%s4186_s1 + $0x210] sm:$0xff] }
  0x8c   :  { %1797 = vmatprep.subr.bf16.mxu0 %v2697_v48  ;;  %v260_v48 = vld [vmem:[%s4186_s1 + $0x770] sm:$0xff] }
  0x8d   :  { %1837 = vmatpush1.bf16.msra.mxu1 %v2832_v46  ;;  %v256_v46 = vld [vmem:[%s4186_s1 + $0x750] sm:$0xff] }
  0x8e   :  { %1838 = vmatprep.subr.bf16.mxu1 %v2825_v49  ;;  %v2768_v49 = vcombine.low %v136_v33, %v140_v34  ;;  %v92_v26 = vld [vmem:[%s4186_s1 + $0x230] sm:$0xff]  ;;  %v81_v33 = vld [vmem:[%s4186_s1 + $0x1d8] sm:$0xff] }
  0x8f   :  { %1798 = vmatpush1.bf16.msra.mxu0 %v2696_v52  ;;  %v120_v52 = vld [vmem:[%s4186_s1 + $0x310] sm:$0xff]  ;;  %v85_v34 = vld [vmem:[%s4186_s1 + $0x1f8] sm:$0xff]  ;;  %v2720_v37 = vcombine.low %v88_v25, %v92_v26 }
  0x90   :  { %1799 = vmatprep.subr.bf16.mxu0 %v2689_v57  ;;  %v252_v57 = vld [vmem:[%s4186_s1 + $0x730] sm:$0xff]  ;;  %v2753_v63 = vcombine.high %v120_v52, %v124_v53 }
  0x91   :  { %1839 = vmatpush1.bf16.msra.mxu1 %v2824_v55  ;;  %v2889_v55 = vcombine.high %v256_v46, %v260_v48 }
  0x92   :  { %1840 = vmatprep.subr.bf16.mxu1 %v2817_v58  ;;  %v2760_v58 = vcombine.low %v128_v41, %v132_v42  ;;  %v73_v41 = vld [vmem:[%s4186_s1 + $0x198] sm:$0xff] }
  0x93   :  { %1800 = vmatpush1.bf16.msra.mxu0 %v2688_v62  ;;  %v2888_v62 = vcombine.low %v256_v46, %v260_v48  ;;  %v77_v42 = vld [vmem:[%s4186_s1 + $0x1b8] sm:$0xff] }
  0x94   :  { %1801 = vmatprep.subr.bf16.mxu0 %v2681_v2  ;;  %v2881_v2 = vcombine.high %v248_v54, %v252_v57  ;;  %v2707_v48 = vcombine.high %v73_v41, %v77_v42 }
  0x95   :  { %1841 = vmatpush1.bf16.msra.mxu1 %v2816_v1  ;;  %v244_v1 = vld [vmem:[%s4186_s1 + $0x6f0] sm:$0xff] }
  0x96   :  { %1842 = vmatprep.subr.bf16.mxu1 %v2809_v4  ;;  %v2752_v4 = vcombine.low %v120_v52, %v124_v53  ;;  %v193_v52 = vld [vmem:[%s4186_s1 + $0x558] sm:$0xff] }
  0x97   :  { %1802 = vmatpush1.bf16.msra.mxu0 %v2680_v7  ;;  %v2880_v7 = vcombine.low %v248_v54, %v252_v57  ;;  %v197_v53 = vld [vmem:[%s4186_s1 + $0x578] sm:$0xff]  ;;  %v2706_v54 = vcombine.low %v73_v41, %v77_v42 }
  0x98   :  { %1803 = vmatprep.subr.bf16.mxu0 %v2673_v12  ;;  %v2873_v12 = vcombine.high %v240_v0, %v244_v1 }
  0x99   :  { %1843 = vmatpush1.bf16.msra.mxu1 %v2808_v11  ;;  %v236_v11 = vld [vmem:[%s4186_s1 + $0x6b0] sm:$0xff] }
  0x9a   :  { %1844 = vmatprep.subr.bf16.mxu1 %v2801_v15  ;;  %v100_v15 = vld [vmem:[%s4186_s1 + $0x270] sm:$0xff]  ;;  %v2864_v23 = vcombine.low %v232_v10, %v236_v11 }
  0x9b   :  { %1804 = vmatpush1.bf16.msra.mxu0 %v2672_v16  ;;  %v2872_v16 = vcombine.low %v240_v0, %v244_v1  ;;  %v2728_v29 = vcombine.low %v96_v14, %v100_v15  ;;  %v2826_v1 = vcombine.low %v193_v52, %v197_v53 }
  0x9c   :  { %1805 = vmatprep.subr.bf16.mxu0 %v2665_v21  ;;  %v2865_v21 = vcombine.high %v232_v10, %v236_v11 }
  0x9d   :  { %1845 = vmatpush1.bf16.msra.mxu1 %v2800_v20  ;;  %v228_v20 = vld [vmem:[%s4186_s1 + $0x670] sm:$0xff] }
  0x9e   :  { %1846 = vmatprep.subr.bf16.mxu1 %v2793_v24  ;;  %v2729_v24 = vcombine.high %v96_v14, %v100_v15  ;;  %v2856_v30 = vcombine.low %v224_v19, %v228_v20  ;;  %v169_v14 = vld [vmem:[%s4186_s1 + $0x498] sm:$0xff] }
  0x9f   :  { %1806 = vmatpush1.bf16.msra.mxu0 %v2664_v56  ;;  %v2857_v56 = vcombine.high %v224_v19, %v228_v20  ;;  %v173_v15 = vld [vmem:[%s4186_s1 + $0x4b8] sm:$0xff] }
  0xa0   :  { %1807 = vmatprep.subr.bf16.mxu0 %v2657_v28  ;;  %v220_v28 = vld [vmem:[%s4186_s1 + $0x630] sm:$0xff]  ;;  %v2803_v20 = vcombine.high %v169_v14, %v173_v15 }
  0xa1   :  { %1847 = vmatpush1.bf16.msra.mxu1 %v2792_v27  ;;  %v216_v27 = vld [vmem:[%s4186_s1 + $0x610] sm:$0xff] }
  0xa2   :  { %1848 = vmatprep.subr.bf16.mxu1 %v2785_v31  ;;  %v2721_v31 = vcombine.high %v88_v25, %v92_v26  ;;  %v2848_v38 = vcombine.low %v216_v27, %v220_v28  ;;  %v2802_v25 = vcombine.low %v169_v14, %v173_v15  ;;  %v105_v15 = vld [vmem:[%s4186_s1 + $0x298] sm:$0xff] }
  0xa3   :  { %1808 = vmatpush1.bf16.msra.mxu0 %v2656_v32  ;;  %v2849_v32 = vcombine.high %v216_v27, %v220_v28  ;;  %v25_v28 = vld [vmem:[%s4186_s1 + $0x18] sm:$0xff] }
  0xa4   :  { %1809 = vmatprep.subr.bf16.mxu0 %v2777_v36  ;;  %v213_v36 = vld [vmem:[%s4186_s1 + $0x5f8] sm:$0xff] }
  0xa5   :  { %1849 = vmatpush1.bf16.msra.mxu1 %v2784_v35  ;;  %v209_v35 = vld [vmem:[%s4186_s1 + $0x5d8] sm:$0xff] }
  0xa6   :  { %1850 = vmatprep.subr.bf16.mxu1 %v2905_v39  ;;  %v2715_v39 = vcombine.high %v81_v33, %v85_v34  ;;  %v2842_v46 = vcombine.low %v209_v35, %v213_v36 }
  0xa7   :  { %1810 = vmatpush2.bf16.msra.mxu0 %v2776_v40  ;;  %v2843_v40 = vcombine.high %v209_v35, %v213_v36  ;;  %v145_v36 = vld [vmem:[%s4186_s1 + $0x3d8] sm:$0xff] }
  0xa8   :  { %1811 = vmatprep.subr.bf16.mxu0 %v2769_v44  ;;  %v205_v44 = vld [vmem:[%s4186_s1 + $0x5b8] sm:$0xff] }
  0xa9   :  { %1851 = vmatpush2.bf16.msra.mxu1 %v2904_v43  ;;  %v201_v43 = vld [vmem:[%s4186_s1 + $0x598] sm:$0xff] }
  0xaa   :  { %1852 = vmatprep.subr.bf16.mxu1 %v2897_v45  ;;  %v2714_v45 = vcombine.low %v81_v33, %v85_v34 }
  0xab   :  { %1812 = vmatpush2.bf16.msra.mxu0 %v2768_v49  ;;  %v2835_v49 = vcombine.high %v201_v43, %v205_v44 }
  0xac   :  { %1813 = vmatprep.subr.bf16.mxu0 %v2761_v51  ;;  %v69_v51 = vld [vmem:[%s4186_s1 + $0x178] sm:$0xff] }
  0xad   :  { %1853 = vmatpush2.bf16.msra.mxu1 %v2896_v50  ;;  %v65_v50 = vld [vmem:[%s4186_s1 + $0x158] sm:$0xff] }
  0xae   :  { %1854 = vmatprep.subr.bf16.mxu1 %v2889_v55  ;;  %v2834_v55 = vcombine.low %v201_v43, %v205_v44  ;;  %v2699_v57 = vcombine.high %v65_v50, %v69_v51  ;;  %v2698_v0 = vcombine.low %v65_v50, %v69_v51  ;;  %v137_v44 = vld [vmem:[%s4186_s1 + $0x398] sm:$0xff] }
  0xaf   :  { %1814 = vmatpush2.bf16.msra.mxu0 %v2760_v58  ;;  %v2827_v58 = vcombine.high %v193_v52, %v197_v53  ;;  %v129_v53 = vld [vmem:[%s4186_s1 + $0x358] sm:$0xff] }
  0xb0   :  { %1815 = vmatprep.subr.bf16.mxu0 %v2753_v63  ;;  %v189_v63 = vld [vmem:[%s4186_s1 + $0x538] sm:$0xff] }
  0xb1   :  { %1855 = vmatpush2.bf16.msra.mxu1 %v2888_v62  ;;  %v185_v62 = vld [vmem:[%s4186_s1 + $0x518] sm:$0xff] }
  0xb2   :  { %1856 = vmatprep.subr.bf16.mxu1 %v2881_v2  ;;  %v2691_v2 = vcombine.high %v57_v60, %v61_v61 }
  0xb3   :  { %1816 = vmatpush2.bf16.msra.mxu0 %v2752_v4  ;;  %v2819_v4 = vcombine.high %v185_v62, %v189_v63 }
  0xb4   :  { %1817 = vmatprep.subr.bf16.mxu0 %v2745_v8  ;;  %v2818_v8 = vcombine.low %v185_v62, %v189_v63  ;;  %v121_v63 = vld [vmem:[%s4186_s1 + $0x318] sm:$0xff] }
  0xb5   :  { %1857 = vmatpush2.bf16.msra.mxu1 %v2880_v7  ;;  %v2690_v7 = vcombine.low %v57_v60, %v61_v61 }
  0xb6   :  { %1858 = vmatprep.subr.bf16.mxu1 %v2873_v12  ;;  %v41_v12 = vld [vmem:[%s4186_s1 + $0x98] sm:$0xff] }
  0xb7   :  { %1818 = vmatpush2.bf16.msra.mxu0 %v2744_v13  ;;  %v45_v13 = vld [vmem:[%s4186_s1 + $0xb8] sm:$0xff] }
  0xb8   :  { %1819 = vmatprep.subr.bf16.mxu0 %v2737_v17  ;;  %v2675_v19 = vcombine.high %v41_v12, %v45_v13 }
  0xb9   :  { %1859 = vmatpush2.bf16.msra.mxu1 %v2872_v16 }
  0xba   :  { %1860 = vmatprep.subr.bf16.mxu1 %v2865_v21  ;;  %v33_v21 = vld [vmem:[%s4186_s1 + $0x58] sm:$0xff] }
  0xbb   :  { %1820 = vmatpush2.bf16.msra.mxu0 %v2736_v22  ;;  %v37_v22 = vld [vmem:[%s4186_s1 + $0x78] sm:$0xff] }
  0xbc   :  { %1821 = vmatprep.subr.bf16.mxu0 %v2729_v24  ;;  %v165_v24 = vld [vmem:[%s4186_s1 + $0x478] sm:$0xff]  ;;  %v2667_v26 = vcombine.high %v33_v21, %v37_v22 }
  0xbd   :  { %1861 = vmatpush2.bf16.msra.mxu1 %v2864_v23  ;;  %v161_v23 = vld [vmem:[%s4186_s1 + $0x458] sm:$0xff] }
  0xbe   :  { %1862 = vmatprep.subr.bf16.mxu1 %v2857_v56  ;;  %v2674_v56 = vcombine.low %v41_v12, %v45_v13  ;;  %v2795_v27 = vcombine.high %v161_v23, %v165_v24  ;;  %v2794_v33 = vcombine.low %v161_v23, %v165_v24  ;;  %v97_v24 = vld [vmem:[%s4186_s1 + $0x258] sm:$0xff] }
  0xbf   :  { %1822 = vmatpush2.bf16.msra.mxu0 %v2728_v29  ;;  %v29_v29 = vld [vmem:[%s4186_s1 + $0x38] sm:$0xff] }
  0xc0   :  { %1823 = vmatprep.subr.bf16.mxu0 %v2721_v31  ;;  %v157_v31 = vld [vmem:[%s4186_s1 + $0x438] sm:$0xff]  ;;  %v2659_v34 = vcombine.high %v25_v28, %v29_v29 }
  0xc1   :  { %1863 = vmatpush2.bf16.msra.mxu1 %v2856_v30  ;;  %v153_v30 = vld [vmem:[%s4186_s1 + $0x418] sm:$0xff] }
  0xc2   :  { %1864 = vmatprep.subr.bf16.mxu1 %v2849_v32  ;;  %v2666_v32 = vcombine.low %v33_v21, %v37_v22  ;;  %v2787_v35 = vcombine.high %v153_v30, %v157_v31  ;;  %v2786_v41 = vcombine.low %v153_v30, %v157_v31  ;;  %v89_v31 = vld [vmem:[%s4186_s1 + $0x218] sm:$0xff] }
  0xc3   :  { %1824 = vmatpush2.bf16.msra.mxu0 %v2720_v37  ;;  %v149_v37 = vld [vmem:[%s4186_s1 + $0x3f8] sm:$0xff] }
  0xc4   :  { %1875 = vmatprep.subr.bf16.mxu0 %v2715_v39  ;;  %v277_v39 = vld [vmem:[%s4186_s1 + $0x7f8] sm:$0xff]  ;;  %v2779_v42 = vcombine.high %v145_v36, %v149_v37 }
  0xc5   :  { %1865 = vmatpush2.bf16.msra.mxu1 %v2848_v38  ;;  %v273_v38 = vld [vmem:[%s4186_s1 + $0x7d8] sm:$0xff] }
  0xc6   :  { %1916 = vmatprep.subr.bf16.mxu1 %v2843_v40  ;;  %1826 = vmatmul.mubr.bf16.vlgmr.msra.gmra.mxu0 %v3383_v18  ;;  %v2658_v40 = vcombine.low %v25_v28, %v29_v29  ;;  %v2907_v43 = vcombine.high %v273_v38, %v277_v39  ;;  %v2906_v50 = vcombine.low %v273_v38, %v277_v39 }
  0xc7   :  { %1876 = vmatpush1.bf16.msra.mxu0 %v2714_v45  ;;  %1907 = vmatprep.mubr.bf16.mxu0 %v3265_v3  ;;  %v49_v3 = vld [vmem:[%s4186_s1 + $0xd8] sm:$0xff] }
  0xc8   :  { %1867 = vmatmul.mubr.bf16.vlgmr.msra.gmra.mxu1 %v3399_v59  ;;  %1877 = vmatprep.subr.bf16.mxu0 %v2707_v48  ;;  %v2683_v10 = vcombine.high %v49_v3, %v53_v5  ;;  %v2682_v16 = vcombine.low %v49_v3, %v53_v5  ;;  %v141_v45 = vld [vmem:[%s4186_s1 + $0x3b8] sm:$0xff] }
  0xc9   :  { %1917 = vmatpush1.bf16.msra.mxu1 %v2842_v46  ;;  %1948 = vmatprep.mubr.bf16.mxu1 %v3276_v9  ;;  %v177_v9 = vld [vmem:[%s4186_s1 + $0x4d8] sm:$0xff]  ;;  %v2771_v51 = vcombine.high %v137_v44, %v141_v45 }
  0xca   :  { %1918 = vmatprep.subr.bf16.mxu1 %v2835_v49  ;;  %v2811_v11 = vcombine.high %v177_v9, %v181_v6  ;;  %v2810_v17 = vcombine.low %v177_v9, %v181_v6  ;;  %v265_v46 = vld [vmem:[%s4186_s1 + $0x798] sm:$0xff]  ;;  %v2778_v49 = vcombine.low %v145_v36, %v149_v37 }
  0xcb   :  { %1878 = vmatpush1.bf16.msra.mxu0 %v2706_v54  ;;  %v269_v48 = vld [vmem:[%s4186_s1 + $0x7b8] sm:$0xff] }
  0xcc   :  { %1879 = vmatprep.subr.bf16.mxu0 %v2699_v57  ;;  %v2899_v52 = vcombine.high %v265_v46, %v269_v48  ;;  %v133_v54 = vld [vmem:[%s4186_s1 + $0x378] sm:$0xff]  ;;  %v2898_v60 = vcombine.low %v265_v46, %v269_v48  ;;  %v3063_v46 = vld [vmem:[%s4188_s3 + $0x70] sm:$0xff]  }
  0xcd   :  { %1919 = vmatpush1.bf16.msra.mxu1 %v2834_v55  ;;  %v257_v55 = vld [vmem:[%s4186_s1 + $0x758] sm:$0xff]  ;;  %v2763_v61 = vcombine.high %v129_v53, %v133_v54 }
  0xce   :  { %1920 = vmatprep.subr.bf16.mxu1 %v2827_v58  ;;  %v261_v57 = vld [vmem:[%s4186_s1 + $0x778] sm:$0xff]  ;;  %v2770_v58 = vcombine.low %v137_v44, %v141_v45  ;;  %v3975_v44 = vld [vmem:[%s4189_s2] sm:$0xff] }
  0xcf   :  { %1880 = vmatpush1.bf16.msra.mxu0 %v2698_v0  ;;  %v2891_v62 = vcombine.high %v257_v55, %v261_v57  ;;  %v125_v0 = vld [vmem:[%s4186_s1 + $0x338] sm:$0xff]  ;;  %v2890_v3 = vcombine.low %v257_v55, %v261_v57  ;;  %v3065_v55 = vld [vmem:[%s4188_s3 + $0x68] sm:$0xff]   ;;  %v3080_v57 = vld [vmem:[%s4188_s3 + $0xb0] sm:$0xff]  }
  0xd0   :  { %1881 = vmatprep.subr.bf16.mxu0 %v2691_v2  ;;  %v253_v2 = vld [vmem:[%s4186_s1 + $0x738] sm:$0xff]  ;;  %v2755_v5 = vcombine.high %v121_v63, %v125_v0 }
  0xd1   :  { %1921 = vmatpush1.bf16.msra.mxu1 %v2826_v1  ;;  %v249_v1 = vld [vmem:[%s4186_s1 + $0x718] sm:$0xff] }
  0xd2   :  { %1922 = vmatprep.subr.bf16.mxu1 %v2819_v4  ;;  %v2762_v4 = vcombine.low %v129_v53, %v133_v54  ;;  %v2883_v9 = vcombine.high %v249_v1, %v253_v2  ;;  %v113_v6 = vld [vmem:[%s4186_s1 + $0x2d8] sm:$0xff]  ;;  %v2882_v12 = vcombine.low %v249_v1, %v253_v2  ;;  %v3064_v53 = vld [vmem:[%s4188_s3 + $0x30] sm:$0xff]   ;;  %v3067_v1 = vld [vmem:[%s4188_s3 + $0x60] sm:$0xff]  }
  0xd3   :  { %1882 = vmatpush1.bf16.msra.mxu0 %v2690_v7  ;;  %v117_v7 = vld [vmem:[%s4186_s1 + $0x2f8] sm:$0xff]  ;;  %v3082_v2 = vld [vmem:[%s4188_s3 + $0xa8] sm:$0xff]  }
  0xd4   :  { %1883 = vmatprep.subr.bf16.mxu0 %v2683_v10  ;;  %v245_v10 = vld [vmem:[%s4186_s1 + $0x6f8] sm:$0xff]  ;;  %v2747_v13 = vcombine.high %v113_v6, %v117_v7 }
  0xd5   :  { %1923 = vmatpush1.bf16.msra.mxu1 %v2818_v8  ;;  %v241_v8 = vld [vmem:[%s4186_s1 + $0x6d8] sm:$0xff] }
  0xd6   :  { %1924 = vmatprep.subr.bf16.mxu1 %v2811_v11  ;;  %v2754_v11 = vcombine.low %v121_v63, %v125_v0  ;;  %v2875_v14 = vcombine.high %v241_v8, %v245_v10  ;;  %v2874_v21 = vcombine.low %v241_v8, %v245_v10  ;;  %v3062_v45 = vld [vmem:[%s4188_s3 + $0x38] sm:$0xff]   ;;  %v3066_v63 = vld [vmem:[%s4188_s3 + $0x28] sm:$0xff]   ;;  %v3084_v10 = vld [vmem:[%s4188_s3 + $0xa0] sm:$0xff]  }
  0xd7   :  { %1884 = vmatpush1.bf16.msra.mxu0 %v2682_v16  ;;  %v109_v16 = vld [vmem:[%s4186_s1 + $0x2b8] sm:$0xff] }
  0xd8   :  { %1885 = vmatprep.subr.bf16.mxu0 %v2675_v19  ;;  %v237_v19 = vld [vmem:[%s4186_s1 + $0x6b8] sm:$0xff]  ;;  %v2739_v22 = vcombine.high %v105_v15, %v109_v16 }
  0xd9   :  { %1925 = vmatpush1.bf16.msra.mxu1 %v2810_v17  ;;  %v233_v17 = vld [vmem:[%s4186_s1 + $0x698] sm:$0xff] }
  0xda   :  { %1926 = vmatprep.subr.bf16.mxu1 %v2803_v20  ;;  %v2746_v20 = vcombine.low %v113_v6, %v117_v7  ;;  %v2867_v23 = vcombine.high %v233_v17, %v237_v19  ;;  %v2866_v28 = vcombine.low %v233_v17, %v237_v19  ;;  %v3078_v48 = vld [vmem:[%s4188_s3 + $0xb8] sm:$0xff]   ;;  %v3068_v6 = vld [vmem:[%s4188_s3 + $0x20] sm:$0xff]   ;;  %v1591_v7 = vsub.s32 0, %v3228_v47  ;;  %v3072_v17 = vld [vmem:[%s4188_s3 + $0x10] sm:$0xff]  }
  0xdb   :  { %1886 = vmatpush1.bf16.msra.mxu0 %v2674_v56  ;;  %v101_v56 = vld [vmem:[%s4186_s1 + $0x278] sm:$0xff] }
  0xdc   :  { %1887 = vmatprep.subr.bf16.mxu0 %v2667_v26  ;;  %v229_v26 = vld [vmem:[%s4186_s1 + $0x678] sm:$0xff]  ;;  %v2731_v29 = vcombine.high %v97_v24, %v101_v56 }
  0xdd   :  { %1927 = vmatpush1.bf16.msra.mxu1 %v2802_v25  ;;  %v225_v25 = vld [vmem:[%s4186_s1 + $0x658] sm:$0xff] }
  0xde   :  { %1928 = vmatprep.subr.bf16.mxu1 %v2795_v27  ;;  %v2738_v27 = vcombine.low %v105_v15, %v109_v16  ;;  %v2859_v30 = vcombine.high %v225_v25, %v229_v26  ;;  %v2858_v36 = vcombine.low %v225_v25, %v229_v26  ;;  %v3069_v8 = vld [vmem:[%s4188_s3 + $0x58] sm:$0xff]   ;;  %v3087_v16 = vld [vmem:[%s4188_s3 + $0xd0] sm:$0xff]   ;;  %v3090_v25 = vld [vmem:[%s4188_s3 + $0x88] sm:$0xff]  }
  0xdf   :  { %1888 = vmatpush1.bf16.msra.mxu0 %v2666_v32  ;;  %v93_v32 = vld [vmem:[%s4186_s1 + $0x238] sm:$0xff]  ;;  %v3091_v26 = vld [vmem:[%s4188_s3 + $0xc0] sm:$0xff]  }
  0xe0   :  { %1889 = vmatprep.subr.bf16.mxu0 %v2659_v34  ;;  %v221_v34 = vld [vmem:[%s4186_s1 + $0x638] sm:$0xff]  ;;  %v2723_v37 = vcombine.high %v89_v31, %v93_v32  ;;  %v2722_v39 = vcombine.low %v89_v31, %v93_v32 }
  0xe1   :  { %1929 = vmatpush1.bf16.msra.mxu1 %v2794_v33  ;;  %v217_v33 = vld [vmem:[%s4186_s1 + $0x618] sm:$0xff] }
  0xe2   :  { %1930 = vmatprep.subr.bf16.mxu1 %v2787_v35  ;;  %v2730_v35 = vcombine.low %v97_v24, %v101_v56  ;;  %v2851_v38 = vcombine.high %v217_v33, %v221_v34  ;;  %v3086_v15 = vld [vmem:[%s4188_s3 + $0x98] sm:$0xff]   ;;  %v3075_v56 = vld [vmem:[%s4188_s3 + $0x40] sm:$0xff]  }
  0xe3   :  { %1890 = vmatpush1.bf16.msra.mxu0 %v2658_v40  ;;  %v2850_v40 = vcombine.low %v217_v33, %v221_v34  ;;  %v3109_v31 = vld [vmem:[%s4188_s3 + $0x1f8] sm:$0xff]   ;;  %v3095_v34 = vld [vmem:[%s4188_s3 + $0x170] sm:$0xff]  }
  0xe4   :  { %1891 = vmatprep.subr.bf16.mxu0 %v2779_v42  ;;  %v1595_v42 = vsub.s32 1, %v3228_v47  ;;  %v3094_v32 = vld [vmem:[%s4188_s3 + $0x138] sm:$0xff]  }
  0xe5   :  { %1931 = vmatpush1.bf16.msra.mxu1 %v2786_v41  ;;  %v3061_v41 = vld [vmem:[%s4188_s3 + $0x78] sm:$0xff]  }
  0xe6   :  { %1932 = vmatprep.subr.bf16.mxu1 %v2907_v43  ;;  %v3077_v43 = vld [vmem:[%s4188_s3 + $0xf8] sm:$0xff]  }
  0xe7   :  { %1892 = vmatpush2.bf16.msra.mxu0 %v2778_v49  ;;  %v1596_v49 = vrot.slane %v3975_v44, %v1595_v42  ;;  %v3103_v42 = vld [vmem:[%s4188_s3 + $0x150] sm:$0xff]  }
  0xe8   :  { %1893 = vmatprep.subr.bf16.mxu0 %v2771_v51 }
  0xe9   :  { %1933 = vmatpush2.bf16.msra.mxu1 %v2906_v50  ;;  %v3079_v50 = vld [vmem:[%s4188_s3 + $0xf0] sm:$0xff]  }
  0xea   :  { %1934 = vmatprep.subr.bf16.mxu1 %v2899_v52 }
  0xeb   :  { %1894 = vmatpush2.bf16.msra.mxu0 %v2770_v58 }
  0xec   :  { %1895 = vmatprep.subr.bf16.mxu0 %v2763_v61 }
  0xed   :  { %1935 = vmatpush2.bf16.msra.mxu1 %v2898_v60 }
  0xee   :  { %1936 = vmatprep.subr.bf16.mxu1 %v2891_v62 }
  0xef   :  { %1896 = vmatpush2.bf16.msra.mxu0 %v2762_v4 }
  0xf0   :  { %1897 = vmatprep.subr.bf16.mxu0 %v2755_v5  ;;  %v3083_v5 = vld [vmem:[%s4188_s3 + $0xe0] sm:$0xff]  }
  0xf1   :  { %1937 = vmatpush2.bf16.msra.mxu1 %v2890_v3 }
  0xf2   :  { %1938 = vmatprep.subr.bf16.mxu1 %v2883_v9 }
  0xf3   :  { %1898 = vmatpush2.bf16.msra.mxu0 %v2754_v11  ;;  %v3085_v11 = vld [vmem:[%s4188_s3 + $0xd8] sm:$0xff]  }
  0xf4   :  { %1899 = vmatprep.subr.bf16.mxu0 %v2747_v13  ;;  %v1592_v13 = vrot.slane %v3975_v44, %v1591_v7  ;;  %v3112_v7 = vld [vmem:[%s4188_s3 + $0x1b0] sm:$0xff]  }
  0xf5   :  { %1939 = vmatpush2.bf16.msra.mxu1 %v2882_v12  ;;  %v3070_v12 = vld [vmem:[%s4188_s3 + $0x18] sm:$0xff]  }
  0xf6   :  { %1940 = vmatprep.subr.bf16.mxu1 %v2875_v14  ;;  %v3071_v14 = vld [vmem:[%s4188_s3 + $0x50] sm:$0xff]  }
  0xf7   :  { %1900 = vmatpush2.bf16.msra.mxu0 %v2746_v20  ;;  %v3073_v20 = vld [vmem:[%s4188_s3 + $0x48] sm:$0xff]  }
  0xf8   :  { %1901 = vmatprep.subr.bf16.mxu0 %v2739_v22  ;;  %v3089_v22 = vld [vmem:[%s4188_s3 + $0xc8] sm:$0xff]  }
  0xf9   :  { %1941 = vmatpush2.bf16.msra.mxu1 %v2874_v21  ;;  %v3088_v21 = vld [vmem:[%s4188_s3 + $0x90] sm:$0xff]  }
  0xfa   :  { %1942 = vmatprep.subr.bf16.mxu1 %v2867_v23  ;;  %v3074_v23 = vld [vmem:[%s4188_s3 + $0x8] sm:$0xff]  }
  0xfb   :  { %1902 = vmatpush2.bf16.msra.mxu0 %v2738_v27  ;;  %v3076_v27 = vld [vmem:[%s4188_s3] sm:$0xff]  }
  0xfc   :  { %1903 = vmatprep.subr.bf16.mxu0 %v2731_v29  ;;  %v3092_v29 = vld [vmem:[%s4188_s3 + $0x80] sm:$0xff]  }
  0xfd   :  { %1943 = vmatpush2.bf16.msra.mxu1 %v2866_v28 }
  0xfe   :  { %1944 = vmatprep.subr.bf16.mxu1 %v2859_v30  ;;  %v3093_v30 = vld [vmem:[%s4188_s3 + $0x178] sm:$0xff]  }
  0xff   :  { %1904 = vmatpush2.bf16.msra.mxu0 %v2730_v35  ;;  %v3096_v35 = vld [vmem:[%s4188_s3 + $0x130] sm:$0xff]  }
 0x100   :  { %1905 = vmatprep.subr.bf16.mxu0 %v2723_v37  ;;  %v3098_v37 = vld [vmem:[%s4188_s3 + $0x128] sm:$0xff]  }
 0x101   :  { %1945 = vmatpush2.bf16.msra.mxu1 %v2858_v36  ;;  %v3097_v36 = vld [vmem:[%s4188_s3 + $0x168] sm:$0xff]  }
 0x102   :  { %1946 = vmatprep.subr.bf16.mxu1 %v2851_v38  ;;  %v3099_v38 = vld [vmem:[%s4188_s3 + $0x160] sm:$0xff]  }
 0x103   :  { %1906 = vmatpush2.bf16.msra.mxu0 %v2722_v39  ;;  %v3100_v39 = vld [vmem:[%s4188_s3 + $0x120] sm:$0xff]  }
 0x104   :  { %2972 = vmatprep.subr.bf16.mxu0 %v3061_v41  ;;  %v3102_v41 = vld [vmem:[%s4188_s3 + $0x118] sm:$0xff]  }
 0x105   :  { %1947 = vmatpush2.bf16.msra.mxu1 %v2850_v40  ;;  %v3101_v40 = vld [vmem:[%s4188_s3 + $0x158] sm:$0xff]  }
 0x106   :  { %2994 = vmatprep.subr.bf16.mxu1 %v3077_v43  ;;  %v1663_v51 = vpop.f32.mrf.mxu0  ;;  %1908 = vmatmul.mubr.bf16.vlgmr.msra.gmra.mxu0 %v3383_v18  ;;  %v3104_v43 = vld [vmem:[%s4188_s3 + $0x110] sm:$0xff]  }
 0x107   :  { %2973 = vmatpush3.bf16.msra.mxu0 %v3062_v45  ;;  %v1664_v19 = vadd.f32 %v1663_v51, %v1592_v13  ;;  %v3105_v45 = vld [vmem:[%s4188_s3 + $0x148] sm:$0xff]   ;;  %v1603_v51 = vsub.s32 3, %v3228_v47  ;;  %v3117_v13 = vld [vmem:[%s4188_s3 + $0x1d8] sm:$0xff]  }
 0x108   :  { %v1704_v52 = vpop.f32.mrf.mxu1  ;;  %1949 = vmatmul.mubr.bf16.vlgmr.msra.gmra.mxu1 %v3399_v59  ;;  %v1665_v54 = vpop.f32.mrf.mxu0  ;;  %2974 = vmatprep.subr.bf16.mxu0 %v3063_v46  ;;  %v3081_v59 = vld [vmem:[%s4188_s3 + $0xe8] sm:$0xff]  }
 0x109   :  { %2995 = vmatpush3.bf16.msra.mxu1 %v3078_v48  ;;  %v1666_v18 = vadd.f32 %v1665_v54, %v1596_v49  ;;  %v1705_v24 = vadd.f32 %v1704_v52, %v1664_v19  ;;  %v3106_v46 = vld [vmem:[%s4188_s3 + $0x108] sm:$0xff]   ;;  %v3107_v48 = vld [vmem:[%s4188_s3 + $0x140] sm:$0xff]   ;;  %v1599_v49 = vsub.s32 2, %v3228_v47 }
 0x10a   :  { %v1706_v58 = vpop.f32.mrf.mxu1  ;;  %2996 = vmatprep.subr.bf16.mxu1 %v3079_v50  ;;  %v1667_v60 = vpop.f32.mrf.mxu0  ;;  %v3108_v50 = vld [vmem:[%s4188_s3 + $0x100] sm:$0xff]   ;;  %v3122_v19 = vld [vmem:[%s4188_s3 + $0x188] sm:$0xff]  }
 0x10b   :  { %v1707_v61 = vadd.f32 %v1706_v58, %v1666_v18  ;;  %2975 = vmatpush3.bf16.msra.mxu0 %v3064_v53  ;;  %v1957_v28 = vmax.f32 %v1705_v24, 0.0  ;;  %v1600_v52 = vrot.slane %v3975_v44, %v1599_v49  ;;  %v1604_v53 = vrot.slane %v3975_v44, %v1603_v51 }
 0x10c   :  { %v1708_v62 = vpop.f32.mrf.mxu1  ;;  %v1668_v0 = vpop.f32.mrf.mxu0  ;;  %2976 = vmatprep.subr.bf16.mxu0 %v3065_v55 }
 0x10d   :  { %2997 = vmatpush3.bf16.msra.mxu1 %v3080_v57  ;;  %v1958_v4 = vmax.f32 %v1707_v61, 0.0  ;;  %v1965_v33 = vpack.c.bf16 %v1957_v28, %v1957_v28 }
 0x10e   :  { %v1709_v3 = vpop.f32.mrf.mxu1  ;;  %2998 = vmatprep.subr.bf16.mxu1 %v3081_v59 }
 0x10f   :  { %v1966_v9 = vpack.c.bf16 %v1958_v4, %v1958_v4  ;;  %2977 = vmatpush3.bf16.msra.mxu0 %v3066_v63 }
 0x110   :  { %2978 = vmatprep.subr.bf16.mxu0 %v3067_v1 }
 0x111   :  { %2999 = vmatpush3.bf16.msra.mxu1 %v3082_v2  ;;  %2518 = vmatprep.mubr.bf16.mxu0 %v1966_v9 }
 0x112   :  { %3000 = vmatprep.subr.bf16.mxu1 %v3083_v5  ;;  %v3110_v5 = vld [vmem:[%s4188_s3 + $0x1b8] sm:$0xff]  }
 0x113   :  { %2979 = vmatpush3.bf16.msra.mxu0 %v3068_v6  ;;  %v3111_v6 = vld [vmem:[%s4188_s3 + $0x1f0] sm:$0xff]  }
 0x114   :  { %2980 = vmatprep.subr.bf16.mxu0 %v3069_v8  ;;  %v3113_v8 = vld [vmem:[%s4188_s3 + $0x1e8] sm:$0xff]  }
 0x115   :  { %3001 = vmatpush3.bf16.msra.mxu1 %v3084_v10  ;;  %v3114_v10 = vld [vmem:[%s4188_s3 + $0x1a8] sm:$0xff]  }
 0x116   :  { %3002 = vmatprep.subr.bf16.mxu1 %v3085_v11  ;;  %v3115_v11 = vld [vmem:[%s4188_s3 + $0x1e0] sm:$0xff]  }
 0x117   :  { %2981 = vmatpush3.bf16.msra.mxu0 %v3070_v12  ;;  %v3116_v12 = vld [vmem:[%s4188_s3 + $0x1a0] sm:$0xff]  }
 0x118   :  { %2982 = vmatprep.subr.bf16.mxu0 %v3071_v14  ;;  %v3118_v14 = vld [vmem:[%s4188_s3 + $0x198] sm:$0xff]  }
 0x119   :  { %3003 = vmatpush3.bf16.msra.mxu1 %v3086_v15  ;;  %v3119_v15 = vld [vmem:[%s4188_s3 + $0x1d0] sm:$0xff]  }
 0x11a   :  { %3004 = vmatprep.subr.bf16.mxu1 %v3087_v16  ;;  %v3120_v16 = vld [vmem:[%s4188_s3 + $0x190] sm:$0xff]  }
 0x11b   :  { %2983 = vmatpush3.bf16.msra.mxu0 %v3072_v17  ;;  %v3121_v17 = vld [vmem:[%s4188_s3 + $0x1c8] sm:$0xff]  }
 0x11c   :  { %2984 = vmatprep.subr.bf16.mxu0 %v3073_v20  ;;  %v3123_v20 = vld [vmem:[%s4188_s3 + $0x1c0] sm:$0xff]  }
 0x11d   :  { %3005 = vmatpush3.bf16.msra.mxu1 %v3088_v21  ;;  %v3124_v21 = vld [vmem:[%s4188_s3 + $0x180] sm:$0xff]  }
 0x11e   :  { %3006 = vmatprep.subr.bf16.mxu1 %v3089_v22  ;;  %v1607_v22 = vsub.s32 4, %v3228_v47 }
 0x11f   :  { %2985 = vmatpush3.bf16.msra.mxu0 %v3074_v23  ;;  %v1611_v23 = vsub.s32 5, %v3228_v47 }
 0x120   :  { %2986 = vmatprep.subr.bf16.mxu0 %v3075_v56  ;;  %v1608_v24 = vrot.slane %v3975_v44, %v1607_v22 }
 0x121   :  { %3007 = vmatpush3.bf16.msra.mxu1 %v3090_v25  ;;  %v1612_v56 = vrot.slane %v3975_v44, %v1611_v23 }
 0x122   :  { %3008 = vmatprep.subr.bf16.mxu1 %v3091_v26 }
 0x123   :  { %2987 = vmatpush3.bf16.msra.mxu0 %v3076_v27 }
 0x124   :  { %3016 = vmatprep.subr.bf16.mxu0 %v3093_v30 }
 0x125   :  { %3009 = vmatpush3.bf16.msra.mxu1 %v3092_v29 }
 0x126   :  { %3038 = vmatprep.subr.bf16.mxu1 %v3109_v31  ;;  %2519 = vmatmul.mubr.bf16.vlgmr.msra.gmra.mxu0 %v1965_v33 }
 0x127   :  { %3017 = vmatpush3.bf16.msra.mxu0 %v3094_v32 }
 0x128   :  { %3018 = vmatprep.subr.bf16.mxu0 %v3095_v34 }
 0x12b   :  { %3019 = vmatpush3.bf16.msra.mxu0 %v3096_v35 }
 0x12c   :  { %3020 = vmatprep.subr.bf16.mxu0 %v3097_v36 }
 0x12f   :  { %3021 = vmatpush3.bf16.msra.mxu0 %v3098_v37 }
 0x130   :  { %3022 = vmatprep.subr.bf16.mxu0 %v3099_v38 }
 0x133   :  { %3023 = vmatpush3.bf16.msra.mxu0 %v3100_v39 }
 0x134   :  { %3024 = vmatprep.subr.bf16.mxu0 %v3101_v40 }
 0x137   :  { %3025 = vmatpush3.bf16.msra.mxu0 %v3102_v41  ;;  %v1615_v41 = vsub.s32 6, %v3228_v47 }
 0x138   :  { %3026 = vmatprep.subr.bf16.mxu0 %v3103_v42  ;;  %v1619_v42 = vsub.s32 7, %v3228_v47 }
 0x13b   :  { %3027 = vmatpush3.bf16.msra.mxu0 %v3104_v43  ;;  %v1616_v43 = vrot.slane %v3975_v44, %v1615_v41 }
 0x13c   :  { %3028 = vmatprep.subr.bf16.mxu0 %v3105_v45  ;;  %v1620_v45 = vrot.slane %v3975_v44, %v1619_v42 }
 0x13f   :  { %3029 = vmatpush3.bf16.msra.mxu0 %v3106_v46 }
 0x140   :  { %3030 = vmatprep.subr.bf16.mxu0 %v3107_v48 }
 0x143   :  { %3031 = vmatpush3.bf16.msra.mxu0 %v3108_v50 }
 0x146   :  { %v1745_v54 = vpop.f32.mrf.mxu0 }
 0x147   :  { %v1746_v55 = vadd.f32 %v1745_v54, %v1600_v52 }
 0x148   :  { %v1786_v57 = vpop.f32.mrf.mxu1  ;;  %v1747_v18 = vpop.f32.mrf.mxu0 }
 0x149   :  { %v1787_v58 = vadd.f32 %v1786_v57, %v1746_v55  ;;  %v1748_v59 = vadd.f32 %v1747_v18, %v1604_v53 }
 0x14a   :  { %v1788_v60 = vpop.f32.mrf.mxu1  ;;  %v1749_v61 = vpop.f32.mrf.mxu0 }
 0x14b   :  { %v1789_v62 = vadd.f32 %v1788_v60, %v1748_v59  ;;  %v1959_v0 = vmax.f32 %v1787_v58, 0.0 }
 0x14c   :  { %v1790_v63 = vpop.f32.mrf.mxu1  ;;  %v1750_v1 = vpop.f32.mrf.mxu0 }
 0x14d   :  { %v1960_v2 = vmax.f32 %v1789_v62, 0.0  ;;  %v1967_v9 = vpack.c.bf16 %v1959_v0, %v1959_v0 }
 0x14e   :  { %v1791_v4 = vpop.f32.mrf.mxu1 }
 0x14f   :  { %v1968_v3 = vpack.c.bf16 %v1960_v2, %v1960_v2  ;;  %v2101_v2 = vld [vmem:[%s4190_s4] sm:$0x1] }
 0x151   :  { %2558 = vmatprep.mubr.bf16.mxu1 %v1968_v3 }
 0x152   :  { %2559 = vmatmul.mubr.bf16.vlgmr.msra.gmra.mxu1 %v1967_v9 }
 0x153   :  { %3039 = vmatpush3.bf16.msra.mxu1 %v3110_v5 }
 0x154   :  { %3040 = vmatprep.subr.bf16.mxu1 %v3111_v6 }
 0x157   :  { %3041 = vmatpush3.bf16.msra.mxu1 %v3112_v7 }
 0x158   :  { %3042 = vmatprep.subr.bf16.mxu1 %v3113_v8 }
 0x15b   :  { %3043 = vmatpush3.bf16.msra.mxu1 %v3114_v10 }
 0x15c   :  { %3044 = vmatprep.subr.bf16.mxu1 %v3115_v11 }
 0x15f   :  { %3045 = vmatpush3.bf16.msra.mxu1 %v3116_v12 }
 0x160   :  { %3046 = vmatprep.subr.bf16.mxu1 %v3117_v13 }
 0x163   :  { %3047 = vmatpush3.bf16.msra.mxu1 %v3118_v14 }
 0x164   :  { %3048 = vmatprep.subr.bf16.mxu1 %v3119_v15 }
 0x167   :  { %3049 = vmatpush3.bf16.msra.mxu1 %v3120_v16 }
 0x168   :  { %3050 = vmatprep.subr.bf16.mxu1 %v3121_v17 }
 0x16b   :  { %3051 = vmatpush3.bf16.msra.mxu1 %v3122_v19 }
 0x16c   :  { %3052 = vmatprep.subr.bf16.mxu1 %v3123_v20 }
 0x16f   :  { %3053 = vmatpush3.bf16.msra.mxu1 %v3124_v21 }
 0x186   :  { %v1827_v25 = vpop.f32.mrf.mxu0 }
 0x187   :  { %v1828_v26 = vadd.f32 %v1827_v25, %v1608_v24 }
 0x188   :  { %v1868_v27 = vpop.f32.mrf.mxu1  ;;  %v1829_v28 = vpop.f32.mrf.mxu0 }
 0x189   :  { %v1869_v29 = vadd.f32 %v1868_v27, %v1828_v26  ;;  %v1830_v30 = vadd.f32 %v1829_v28, %v1612_v56 }
 0x18a   :  { %v1870_v31 = vpop.f32.mrf.mxu1  ;;  %v1831_v32 = vpop.f32.mrf.mxu0 }
 0x18b   :  { %v1871_v33 = vadd.f32 %v1870_v31, %v1830_v30  ;;  %v1961_v35 = vmax.f32 %v1869_v29, 0.0 }
 0x18c   :  { %v1872_v34 = vpop.f32.mrf.mxu1  ;;  %v1832_v36 = vpop.f32.mrf.mxu0 }
 0x18d   :  { %v1962_v37 = vmax.f32 %v1871_v33, 0.0  ;;  %v1969_v40 = vpack.c.bf16 %v1961_v35, %v1961_v35 }
 0x18e   :  { %v1873_v38 = vpop.f32.mrf.mxu1 }
 0x18f   :  { %v1970_v39 = vpack.c.bf16 %v1962_v37, %v1962_v37 }
 0x191   :  { %2598 = vmatprep.mubr.bf16.mxu0 %v1970_v39 }
 0x192   :  { %2599 = vmatmul.mubr.bf16.vlgmr.msra.gmra.mxu0 %v1969_v40 }
 0x1c6   :  { %v1909_v46 = vpop.f32.mrf.mxu0 }
 0x1c7   :  { %v1910_v48 = vadd.f32 %v1909_v46, %v1616_v43 }
 0x1c8   :  { %v1950_v49 = vpop.f32.mrf.mxu1  ;;  %v1911_v50 = vpop.f32.mrf.mxu0 }
 0x1c9   :  { %v1951_v51 = vadd.f32 %v1950_v49, %v1910_v48  ;;  %v1912_v52 = vadd.f32 %v1911_v50, %v1620_v45 }
 0x1ca   :  { %v1952_v53 = vpop.f32.mrf.mxu1  ;;  %v1913_v54 = vpop.f32.mrf.mxu0 }
 0x1cb   :  { %v1953_v55 = vadd.f32 %v1952_v53, %v1912_v52  ;;  %v1963_v18 = vmax.f32 %v1951_v51, 0.0 }
 0x1cc   :  { %v1954_v57 = vpop.f32.mrf.mxu1  ;;  %v1914_v58 = vpop.f32.mrf.mxu0 }
 0x1cd   :  { %v1964_v59 = vmax.f32 %v1953_v55, 0.0  ;;  %v1971_v47 = vpack.c.bf16 %v1963_v18, %v1963_v18 }
 0x1ce   :  { %v1955_v60 = vpop.f32.mrf.mxu1 }
 0x1cf   :  { %v1972_v61 = vpack.c.bf16 %v1964_v59, %v1964_v59 }
 0x1d1   :  { %2638 = vmatprep.mubr.bf16.mxu1 %v1972_v61 }
 0x1d2   :  { %2639 = vmatmul.mubr.bf16.vlgmr.msra.gmra.mxu1 %v1971_v47 }
 0x1e6   :  { %v2988_v62 = vpop.f32.mrf.mxu0 }
 0x1e8   :  { %v2989_v44 = vpop.f32.mrf.mxu0 }
 0x1e9   :  { %v2990_v63 = vadd.f32 %v2989_v44, %v2988_v62 }
 0x1ea   :  { %v2991_v0 = vpop.f32.mrf.mxu0 }
 0x1eb   :  { %v2521_v5 = vadd.f32 %v2990_v63, %v2101_v2 }
 0x1ec   :  { %v2992_v1 = vpop.f32.mrf.mxu0 }
 0x212   :  { %v3010_v4 = vpop.f32.mrf.mxu1 }
 0x214   :  { %v3011_v3 = vpop.f32.mrf.mxu1 }
 0x215   :  { %v3012_v9 = vadd.f32 %v3011_v3, %v3010_v4 }
 0x216   :  { %v3013_v6 = vpop.f32.mrf.mxu1 }
 0x217   :  { %v2561_v7 = vadd.f32 %v3012_v9, %v2521_v5 }
 0x218   :  { %v3014_v8 = vpop.f32.mrf.mxu1 }
 0x252   :  { %v3032_v10 = vpop.f32.mrf.mxu0 }
 0x254   :  { %v3033_v11 = vpop.f32.mrf.mxu0 }
 0x255   :  { %v3034_v12 = vadd.f32 %v3033_v11, %v3032_v10 }
 0x256   :  { %v3035_v13 = vpop.f32.mrf.mxu0 }
 0x257   :  { %v2601_v14 = vadd.f32 %v3034_v12, %v2561_v7 }
 0x258   :  { %v3036_v15 = vpop.f32.mrf.mxu0 }
 0x292   :  { %v3054_v16 = vpop.f32.mrf.mxu1 }
 0x294   :  { %v3055_v17 = vpop.f32.mrf.mxu1 }
 0x295   :  { %v3056_v19 = vadd.f32 %v3055_v17, %v3054_v16 }
 0x296   :  { %v3057_v20 = vpop.f32.mrf.mxu1 }
 0x297   :  { %v2641_v21 = vadd.f32 %v3056_v19, %v2601_v14 }
 0x298   :  { %v3058_v22 = vpop.f32.mrf.mxu1 }
 0x299   :  { %2646 = vst [vmem:[%s4191_s5] sm:$0x1] %v2641_v21 }

</bundles_post_ra>
